<compile_context>
chip_gen: v7x
topology: tpu7x:2x2x1
jax: 0.10.0
libtpu: 0.0.40
codegen_flags: <defaults>
</compile_context>

<pallas_src>
import jax
import jax.numpy as jnp
import numpy as np
from jax.experimental import pallas as pl
from jax.experimental.pallas import tpu as pltpu

_PI = float(np.pi)     # Python floats -> literals inside the kernel (no captured consts)
_EPS = 1e-9


def _ru8(x):
    return ((x + 7) // 8) * 8


def nodenet_forward(X, e, Ri, Ro, W1, b1, W2, b2, *, num_batch_blocks=1):
    """Batched NodeNet forward.

    X  : [B, N, D] f32, e: [B, E, 1] f32, Ri/Ro: [B, N, E] f32 (0/1 adjacency),
    W1 : [3D, n_qubits], b1: [1, n_qubits], W2: [3, hid_dim], b2: [1, hid_dim]
    (weights stored transposed: y = x @ W + b).  Returns [B, N, hid_dim] f32.
    Rescale01 statistics are per-graph (whole per-graph matrix), as in torch.
    """
    B, N, D = X.shape
    E = Ri.shape[2]
    n_qubits = W1.shape[1]
    hid_dim = W2.shape[1]
    assert B % num_batch_blocks == 0
    gb = B // num_batch_blocks            # graphs per grid step (static)

    hid_p = _ru8(hid_dim)                 # lane-padded output width (dense stores)
    cols = max(n_qubits, hid_p)           # weight-slab lane width

    f32 = jnp.float32

    # ---- wrapper-side layout prep (cheap XLA ops; removes all in-kernel relayouts)
    e_row = jnp.transpose(e, (0, 2, 1)).astype(f32)                    # [B, 1, E]
    ee = jnp.concatenate([e_row, e_row], axis=2)                       # [B, 1, 2E]
    RRT = jnp.concatenate([jnp.transpose(Ro, (0, 2, 1)),
                           jnp.transpose(Ri, (0, 2, 1))], axis=1).astype(f32)  # [B, 2E, N]
    RR = jnp.concatenate([Ri, Ro], axis=2).astype(f32)                 # [B, N, 2E]

    # Packed weight slab; every section starts on an 8-row (sublane-tile) boundary.
    rD = _ru8(D)
    r_w1a, r_w1b, r_w1c = 0, rD, 2 * rD
    r_b1 = 3 * rD
    r_w2 = r_b1 + 8
    r_b2 = r_w2 + _ru8(n_qubits)
    n_rows = r_b2 + 8
    wslab = jnp.zeros((n_rows, cols), f32)
    wslab = wslab.at[r_w1a:r_w1a + D, :n_qubits].set(W1[:D])           # mi block
    wslab = wslab.at[r_w1b:r_w1b + D, :n_qubits].set(W1[D:2 * D])      # mo block
    wslab = wslab.at[r_w1c:r_w1c + D, :n_qubits].set(W1[2 * D:3 * D])  # X  block
    wslab = wslab.at[r_b1:r_b1 + 1, :n_qubits].set(b1)
    wslab = wslab.at[r_w2:r_w2 + 3, :hid_dim].set(W2)   # only first 3 qubit <Z>'s read out
    wslab = wslab.at[r_b2:r_b2 + 1, :hid_dim].set(b2)

    def kernel(x_ref, rrt_ref, rr_ref, ee_ref, w_ref, out_ref):
        # Shared weights: loaded once per grid step via static, sublane-aligned slices.
        w1a = w_ref[r_w1a:r_w1a + D, 0:n_qubits]
        w1b = w_ref[r_w1b:r_w1b + D, 0:n_qubits]
        w1c = w_ref[r_w1c:r_w1c + D, 0:n_qubits]
        b1v = w_ref[r_b1:r_b1 + 1, 0:n_qubits]
        w2v = w_ref[r_w2:r_w2 + n_qubits, 0:hid_p]
        b2v = w_ref[r_b2:r_b2 + 1, 0:hid_p]

        for g in range(gb):                          # fully unrolled static loop
            Xg = x_ref[g]                            # [N, D]
            # bo = Ro^T X ; bi = Ri^T X  (single stacked dot)
            bb = jnp.dot(rrt_ref[g], Xg, preferred_element_type=jnp.float32)   # [2E, D]
            # P = [ bo @ W1a ; bi @ W1b ]
            Pa = jnp.dot(bb[:E], w1a, preferred_element_type=jnp.float32)      # [E, nq]
            Pb = jnp.dot(bb[E:], w1b, preferred_element_type=jnp.float32)      # [E, nq]
            P = jnp.concatenate([Pa, Pb], axis=0)                              # [2E, nq]
            # RW = [Ri*e | Ro*e]  (pure VPU sublane-broadcast multiply)
            RW = rr_ref[g] * ee_ref[g]                                         # [N, 2E]
            # z1 = mi@W1a + mo@W1b + X@W1c + b1  (reassociated message passing)
            z1 = (jnp.dot(RW, P, preferred_element_type=jnp.float32)
                  + jnp.dot(Xg, w1c, preferred_element_type=jnp.float32)
                  + b1v)
            z1 = jnp.maximum(z1, 0.0)                                          # ReLU
            # Rescale01 over the whole per-graph matrix (min/max back-to-back,
            # EUP approx reciprocal; +eps -> constant block maps to 0, not NaN).
            mn1 = jnp.min(z1, keepdims=True)
            mx1 = jnp.max(z1, keepdims=True)
            z1 = (z1 - mn1) * pl.reciprocal(mx1 - mn1 + _EPS, approx=True)
            # TODO(synk): EstimatorQNN (Qiskit parameterized quantum circuit) has no
            # Pallas equivalent; noiseless single-qubit surrogate <Z_k> = cos(theta_k).
            exps = jnp.cos(z1 * _PI)                                           # [N, nq]
            # readout: Linear(3 -> hid) via zero-padded W2, + ReLU + Rescale01.
            z2 = jnp.dot(exps, w2v, preferred_element_type=jnp.float32) + b2v  # [N, hid_p]
            z2 = jnp.maximum(z2, 0.0)
            if hid_dim < hid_p:
                # Exclude zero-padded lanes from the rescale statistics.
                lane = jax.lax.broadcasted_iota(jnp.int32, z2.shape, 1)
                valid = lane < hid_dim
                zmn = jnp.where(valid, z2, float("inf"))
                zmx = jnp.where(valid, z2, float("-inf"))
            else:
                zmn = zmx = z2
            mn2 = jnp.min(zmn, keepdims=True)
            mx2 = jnp.max(zmx, keepdims=True)
            out_ref[g] = (z2 - mn2) / (mx2 - mn2 + _EPS)   # exact divide for the output

    gmap = lambda i: (i, 0, 0)   # per-block of gb graphs
    wmap = lambda i: (0, 0)      # weights resident across the grid

    out = pl.pallas_call(
        kernel,
        out_shape=jax.ShapeDtypeStruct((B, N, hid_p), f32),
        grid_spec=pltpu.PrefetchScalarGridSpec(
            num_scalar_prefetch=0,
            grid=(num_batch_blocks,),
            in_specs=[
                pl.BlockSpec((gb, N, D), gmap),          # X
                pl.BlockSpec((gb, 2 * E, N), gmap),      # [Ro^T ; Ri^T]
                pl.BlockSpec((gb, N, 2 * E), gmap),      # [Ri | Ro]
                pl.BlockSpec((gb, 1, 2 * E), gmap),      # [e | e]
                pl.BlockSpec((n_rows, cols), wmap),      # packed weight slab
            ],
            out_specs=pl.BlockSpec((gb, N, hid_p), gmap),
        ),
        compiler_params=pltpu.CompilerParams(
            dimension_semantics=("parallel",)),          # batch blocks split over TCs (v7x)
    )(X.astype(f32), RRT, RR, ee, wslab)

    return out[..., :hid_dim]


def _nodenet_ref(X, e, Ri, Ro, W1, b1, W2, b2):
    """Pure-JAX reference mirroring the kernel math (exact divides)."""
    def rescale(z):
        return (z - jnp.min(z)) / (jnp.max(z) - jnp.min(z) + _EPS)

    def one_graph(Xg, eg, Rig, Rog):
        bo = Rog.T @ Xg
        bi = Rig.T @ Xg
        Rwi = Rig * eg[:, 0]
        Rwo = Rog * eg[:, 0]
        mi = Rwi @ bo
        mo = Rwo @ bi
        M = jnp.concatenate([mi, mo, Xg], axis=1)
        z1 = jnp.maximum(M @ W1 + b1, 0.0)
        ang = rescale(z1) * _PI
        exps = jnp.cos(ang)[:, :3]
        z2 = jnp.maximum(exps @ W2 + b2, 0.0)
        return rescale(z2)

    return jnp.stack([one_graph(X[b], e[b], Ri[b], Ro[b]) for b in range(X.shape[0])])


if __name__ == "__main__":
    # Shapes consistent with the module: hid_dim=5 -> D = hid_dim+3 = 8,
    # input_size = 3*D = 24, n_qubits = 8; B=4 graphs, N=16 nodes, E=32 edges.
    hid_dim = 5
    D = hid_dim + 3
    n_qubits = 8
    B, N, E = 4, 16, 32

    key = jax.random.PRNGKey(0)
    kx, ke, kri, kro, kw1, kb1, kw2, kb2 = jax.random.split(key, 8)

    X = jax.random.normal(kx, (B, N, D), dtype=jnp.float32)
    e = jax.nn.sigmoid(jax.random.normal(ke, (B, E, 1), dtype=jnp.float32))
    Ri = (jax.random.uniform(kri, (B, N, E)) < 0.2).astype(jnp.float32)
    Ro = (jax.random.uniform(kro, (B, N, E)) < 0.2).astype(jnp.float32)

    lim1 = 1.0 / np.sqrt(3 * D)
    W1 = jax.random.uniform(kw1, (3 * D, n_qubits), minval=-lim1, maxval=lim1,
                            dtype=jnp.float32)
    b1 = jax.random.uniform(kb1, (1, n_qubits), minval=-lim1, maxval=lim1,
                            dtype=jnp.float32)
    lim2 = 1.0 / np.sqrt(3)
    W2 = jax.random.uniform(kw2, (3, hid_dim), minval=-lim2, maxval=lim2,
                            dtype=jnp.float32)
    b2 = jax.random.uniform(kb2, (1, hid_dim), minval=-lim2, maxval=lim2,
                            dtype=jnp.float32)

    out = nodenet_forward(X, e, Ri, Ro, W1, b1, W2, b2)
    out = jax.block_until_ready(out)
    assert out.shape == (B, N, hid_dim)
    assert bool(jnp.all(jnp.isfinite(out)))

    ref = _nodenet_ref(X, e, Ri, Ro, W1, b1, W2, b2)
    assert bool(jnp.all(jnp.abs(out - ref) < 3e-2)), "mismatch vs pure-JAX reference"

    print("KERNEL_OK")
</pallas_src>

<mosaic_0001>
module attributes {stable_mosaic.version = 11 : i64} {
  func.func @kernel(%arg0: i32, %arg1: memref<4x16x8xf32, #tpu.memory_space<vmem>>, %arg2: memref<4x64x16xf32, #tpu.memory_space<vmem>>, %arg3: memref<4x16x64xf32, #tpu.memory_space<vmem>>, %arg4: memref<4x1x64xf32, #tpu.memory_space<vmem>>, %arg5: memref<48x8xf32, #tpu.memory_space<vmem>>, %arg6: memref<4x16x8xf32, #tpu.memory_space<vmem>>) attributes {dimension_semantics = [#tpu.dimension_semantics<parallel>], iteration_bounds = array<i64: 1>, scalar_prefetch = 0 : i64, scratch_operands = 0 : i64, tpu.core_type = #tpu.core_type<tc>, window_params = [{transform_indices = @transform_0, window_bounds = array<i64: 4, 16, 8>}, {transform_indices = @transform_1, window_bounds = array<i64: 4, 64, 16>}, {transform_indices = @transform_2, window_bounds = array<i64: 4, 16, 64>}, {transform_indices = @transform_3, window_bounds = array<i64: 4, 1, 64>}, {pipeline_mode = #tpu.pipeline_mode<synchronous>, transform_indices = @transform_4, window_bounds = array<i64: 48, 8>}, {transform_indices = @transform_5, window_bounds = array<i64: 4, 16, 8>}]} {
    %c0 = arith.constant 0 : index
    %c0_0 = arith.constant 0 : index
    %0 = vector.load %arg5[%c0, %c0_0] : memref<48x8xf32, #tpu.memory_space<vmem>>, vector<8x8xf32>
    %c8 = arith.constant 8 : index
    %c0_1 = arith.constant 0 : index
    %1 = vector.load %arg5[%c8, %c0_1] : memref<48x8xf32, #tpu.memory_space<vmem>>, vector<8x8xf32>
    %c16 = arith.constant 16 : index
    %c0_2 = arith.constant 0 : index
    %2 = vector.load %arg5[%c16, %c0_2] : memref<48x8xf32, #tpu.memory_space<vmem>>, vector<8x8xf32>
    %c24 = arith.constant 24 : index
    %c0_3 = arith.constant 0 : index
    %3 = vector.load %arg5[%c24, %c0_3] : memref<48x8xf32, #tpu.memory_space<vmem>>, vector<1x8xf32>
    %c32 = arith.constant 32 : index
    %c0_4 = arith.constant 0 : index
    %4 = vector.load %arg5[%c32, %c0_4] : memref<48x8xf32, #tpu.memory_space<vmem>>, vector<8x8xf32>
    %c40 = arith.constant 40 : index
    %c0_5 = arith.constant 0 : index
    %5 = vector.load %arg5[%c40, %c0_5] : memref<48x8xf32, #tpu.memory_space<vmem>>, vector<1x8xf32>
    %c0_6 = arith.constant 0 : index
    %c0_7 = arith.constant 0 : index
    %c0_8 = arith.constant 0 : index
    %6 = vector.load %arg1[%c0_6, %c0_7, %c0_8] : memref<4x16x8xf32, #tpu.memory_space<vmem>>, vector<1x16x8xf32>
    %7 = vector.shape_cast %6 : vector<1x16x8xf32> to vector<16x8xf32>
    %c0_9 = arith.constant 0 : index
    %c0_10 = arith.constant 0 : index
    %c0_11 = arith.constant 0 : index
    %8 = vector.load %arg2[%c0_9, %c0_10, %c0_11] : memref<4x64x16xf32, #tpu.memory_space<vmem>>, vector<1x64x16xf32>
    %9 = vector.shape_cast %8 : vector<1x64x16xf32> to vector<64x16xf32>
    %cst = arith.constant dense<0.000000e+00> : vector<64x8xf32>
    %10 = tpu.matmul %9, %7, %cst {dimension_numbers = #tpu.dot_dimension_numbers<[1], [0], [0], [1], [0, 0, 1, 1], [], []>} : vector<64x16xf32>, vector<16x8xf32>, vector<64x8xf32> -> vector<64x8xf32>
    %11 = vector.extract_strided_slice %10 {offsets = [0, 0], sizes = [32, 8], strides = [1, 1]} : vector<64x8xf32> to vector<32x8xf32>
    %cst_12 = arith.constant dense<0.000000e+00> : vector<32x8xf32>
    %12 = tpu.matmul %11, %0, %cst_12 {dimension_numbers = #tpu.dot_dimension_numbers<[1], [0], [0], [1], [0, 0, 1, 1], [], []>} : vector<32x8xf32>, vector<8x8xf32>, vector<32x8xf32> -> vector<32x8xf32>
    %13 = vector.extract_strided_slice %10 {offsets = [32, 0], sizes = [32, 8], strides = [1, 1]} : vector<64x8xf32> to vector<32x8xf32>
    %cst_13 = arith.constant dense<0.000000e+00> : vector<32x8xf32>
    %14 = tpu.matmul %13, %1, %cst_13 {dimension_numbers = #tpu.dot_dimension_numbers<[1], [0], [0], [1], [0, 0, 1, 1], [], []>} : vector<32x8xf32>, vector<8x8xf32>, vector<32x8xf32> -> vector<32x8xf32>
    %15 = tpu.concatenate %12, %14 in 0 : vector<32x8xf32>, vector<32x8xf32> -> vector<64x8xf32>
    %c0_14 = arith.constant 0 : index
    %c0_15 = arith.constant 0 : index
    %c0_16 = arith.constant 0 : index
    %16 = vector.load %arg3[%c0_14, %c0_15, %c0_16] : memref<4x16x64xf32, #tpu.memory_space<vmem>>, vector<1x16x64xf32>
    %17 = vector.shape_cast %16 : vector<1x16x64xf32> to vector<16x64xf32>
    %c0_17 = arith.constant 0 : index
    %c0_18 = arith.constant 0 : index
    %c0_19 = arith.constant 0 : index
    %18 = vector.load %arg4[%c0_17, %c0_18, %c0_19] : memref<4x1x64xf32, #tpu.memory_space<vmem>>, vector<1x1x64xf32>
    %19 = vector.shape_cast %18 : vector<1x1x64xf32> to vector<1x64xf32>
    %20 = vector.broadcast %19 : vector<1x64xf32> to vector<16x64xf32>
    %21 = arith.mulf %17, %20 : vector<16x64xf32>
    %cst_20 = arith.constant dense<0.000000e+00> : vector<16x8xf32>
    %22 = tpu.matmul %21, %15, %cst_20 {dimension_numbers = #tpu.dot_dimension_numbers<[1], [0], [0], [1], [0, 0, 1, 1], [], []>} : vector<16x64xf32>, vector<64x8xf32>, vector<16x8xf32> -> vector<16x8xf32>
    %cst_21 = arith.constant dense<0.000000e+00> : vector<16x8xf32>
    %23 = tpu.matmul %7, %2, %cst_21 {dimension_numbers = #tpu.dot_dimension_numbers<[1], [0], [0], [1], [0, 0, 1, 1], [], []>} : vector<16x8xf32>, vector<8x8xf32>, vector<16x8xf32> -> vector<16x8xf32>
    %24 = arith.addf %22, %23 : vector<16x8xf32>
    %25 = vector.broadcast %3 : vector<1x8xf32> to vector<16x8xf32>
    %26 = arith.addf %24, %25 : vector<16x8xf32>
    %cst_22 = arith.constant 0.000000e+00 : f32
    %27 = vector.broadcast %cst_22 : f32 to vector<16x8xf32>
    %28 = arith.maximumf %26, %27 : vector<16x8xf32>
    %29 = vector.shape_cast %28 : vector<16x8xf32> to vector<1x16x8xf32>
    %cst_23 = arith.constant dense<0x7F800000> : vector<1xf32>
    %30 = vector.multi_reduction <minimumf>, %29, %cst_23 [1, 2] : vector<1x16x8xf32> to vector<1xf32>
    %31 = vector.shape_cast %30 : vector<1xf32> to vector<1x1x1xf32>
    %32 = vector.extract %31[0, 0, 0] : f32 from vector<1x1x1xf32>
    %33 = vector.broadcast %32 : f32 to vector<1x1xf32>
    %34 = vector.shape_cast %28 : vector<16x8xf32> to vector<1x16x8xf32>
    %cst_24 = arith.constant dense<0xFF800000> : vector<1xf32>
    %35 = vector.multi_reduction <maximumf>, %34, %cst_24 [1, 2] : vector<1x16x8xf32> to vector<1xf32>
    %36 = vector.shape_cast %35 : vector<1xf32> to vector<1x1x1xf32>
    %37 = vector.extract %36[0, 0, 0] : f32 from vector<1x1x1xf32>
    %38 = vector.broadcast %37 : f32 to vector<1x1xf32>
    %39 = vector.broadcast %33 : vector<1x1xf32> to vector<16x8xf32>
    %40 = arith.subf %28, %39 : vector<16x8xf32>
    %41 = arith.subf %38, %33 : vector<1x1xf32>
    %cst_25 = arith.constant 9.99999971E-10 : f32
    %42 = vector.broadcast %cst_25 : f32 to vector<1x1xf32>
    %43 = arith.addf %41, %42 : vector<1x1xf32>
    %44 = tpu.reciprocal %43 {approx = true} : vector<1x1xf32> -> vector<1x1xf32>
    %45 = vector.broadcast %44 : vector<1x1xf32> to vector<16x8xf32>
    %46 = arith.mulf %40, %45 : vector<16x8xf32>
    %cst_26 = arith.constant 3.14159274 : f32
    %47 = vector.broadcast %cst_26 : f32 to vector<16x8xf32>
    %48 = arith.mulf %46, %47 : vector<16x8xf32>
    %49 = math.cos %48 : vector<16x8xf32>
    %cst_27 = arith.constant dense<0.000000e+00> : vector<16x8xf32>
    %50 = tpu.matmul %49, %4, %cst_27 {dimension_numbers = #tpu.dot_dimension_numbers<[1], [0], [0], [1], [0, 0, 1, 1], [], []>} : vector<16x8xf32>, vector<8x8xf32>, vector<16x8xf32> -> vector<16x8xf32>
    %51 = vector.broadcast %5 : vector<1x8xf32> to vector<16x8xf32>
    %52 = arith.addf %50, %51 : vector<16x8xf32>
    %cst_28 = arith.constant 0.000000e+00 : f32
    %53 = vector.broadcast %cst_28 : f32 to vector<16x8xf32>
    %54 = arith.maximumf %52, %53 : vector<16x8xf32>
    %55 = tpu.iota {dimensions = array<i32: 1>} : vector<16x8xi32>
    %c5_i32 = arith.constant 5 : i32
    %56 = vector.broadcast %c5_i32 : i32 to vector<16x8xi32>
    %57 = arith.cmpi slt, %55, %56 : vector<16x8xi32>
    %cst_29 = arith.constant 0x7F800000 : f32
    %58 = vector.broadcast %cst_29 : f32 to vector<16x8xf32>
    %59 = arith.select %57, %54, %58 : vector<16x8xi1>, vector<16x8xf32>
    %cst_30 = arith.constant 0xFF800000 : f32
    %60 = vector.broadcast %cst_30 : f32 to vector<16x8xf32>
    %61 = arith.select %57, %54, %60 : vector<16x8xi1>, vector<16x8xf32>
    %62 = vector.shape_cast %59 : vector<16x8xf32> to vector<1x16x8xf32>
    %cst_31 = arith.constant dense<0x7F800000> : vector<1xf32>
    %63 = vector.multi_reduction <minimumf>, %62, %cst_31 [1, 2] : vector<1x16x8xf32> to vector<1xf32>
    %64 = vector.shape_cast %63 : vector<1xf32> to vector<1x1x1xf32>
    %65 = vector.extract %64[0, 0, 0] : f32 from vector<1x1x1xf32>
    %66 = vector.broadcast %65 : f32 to vector<1x1xf32>
    %67 = vector.shape_cast %61 : vector<16x8xf32> to vector<1x16x8xf32>
    %cst_32 = arith.constant dense<0xFF800000> : vector<1xf32>
    %68 = vector.multi_reduction <maximumf>, %67, %cst_32 [1, 2] : vector<1x16x8xf32> to vector<1xf32>
    %69 = vector.shape_cast %68 : vector<1xf32> to vector<1x1x1xf32>
    %70 = vector.extract %69[0, 0, 0] : f32 from vector<1x1x1xf32>
    %71 = vector.broadcast %70 : f32 to vector<1x1xf32>
    %72 = vector.broadcast %66 : vector<1x1xf32> to vector<16x8xf32>
    %73 = arith.subf %54, %72 : vector<16x8xf32>
    %74 = arith.subf %71, %66 : vector<1x1xf32>
    %cst_33 = arith.constant 9.99999971E-10 : f32
    %75 = vector.broadcast %cst_33 : f32 to vector<1x1xf32>
    %76 = arith.addf %74, %75 : vector<1x1xf32>
    %77 = vector.broadcast %76 : vector<1x1xf32> to vector<16x8xf32>
    %78 = arith.divf %73, %77 : vector<16x8xf32>
    %c0_34 = arith.constant 0 : index
    %c0_35 = arith.constant 0 : index
    %c0_36 = arith.constant 0 : index
    %79 = vector.load %arg6[%c0_34, %c0_35, %c0_36] : memref<4x16x8xf32, #tpu.memory_space<vmem>>, vector<1x16x8xf32>
    %80 = vector.shape_cast %79 : vector<1x16x8xf32> to vector<16x8xf32>
    %81 = vector.shape_cast %78 : vector<16x8xf32> to vector<1x16x8xf32>
    tpu.vector_store %arg6[%c0_34, %c0_35, %c0_36], %81 {strides = array<i32>} : memref<4x16x8xf32, #tpu.memory_space<vmem>>, vector<1x16x8xf32>,
    %c1 = arith.constant 1 : index
    %c0_37 = arith.constant 0 : index
    %c0_38 = arith.constant 0 : index
    %82 = vector.load %arg1[%c1, %c0_37, %c0_38] : memref<4x16x8xf32, #tpu.memory_space<vmem>>, vector<1x16x8xf32>
    %83 = vector.shape_cast %82 : vector<1x16x8xf32> to vector<16x8xf32>
    %c1_39 = arith.constant 1 : index
    %c0_40 = arith.constant 0 : index
    %c0_41 = arith.constant 0 : index
    %84 = vector.load %arg2[%c1_39, %c0_40, %c0_41] : memref<4x64x16xf32, #tpu.memory_space<vmem>>, vector<1x64x16xf32>
    %85 = vector.shape_cast %84 : vector<1x64x16xf32> to vector<64x16xf32>
    %cst_42 = arith.constant dense<0.000000e+00> : vector<64x8xf32>
    %86 = tpu.matmul %85, %83, %cst_42 {dimension_numbers = #tpu.dot_dimension_numbers<[1], [0], [0], [1], [0, 0, 1, 1], [], []>} : vector<64x16xf32>, vector<16x8xf32>, vector<64x8xf32> -> vector<64x8xf32>
    %87 = vector.extract_strided_slice %86 {offsets = [0, 0], sizes = [32, 8], strides = [1, 1]} : vector<64x8xf32> to vector<32x8xf32>
    %cst_43 = arith.constant dense<0.000000e+00> : vector<32x8xf32>
    %88 = tpu.matmul %87, %0, %cst_43 {dimension_numbers = #tpu.dot_dimension_numbers<[1], [0], [0], [1], [0, 0, 1, 1], [], []>} : vector<32x8xf32>, vector<8x8xf32>, vector<32x8xf32> -> vector<32x8xf32>
    %89 = vector.extract_strided_slice %86 {offsets = [32, 0], sizes = [32, 8], strides = [1, 1]} : vector<64x8xf32> to vector<32x8xf32>
    %cst_44 = arith.constant dense<0.000000e+00> : vector<32x8xf32>
    %90 = tpu.matmul %89, %1, %cst_44 {dimension_numbers = #tpu.dot_dimension_numbers<[1], [0], [0], [1], [0, 0, 1, 1], [], []>} : vector<32x8xf32>, vector<8x8xf32>, vector<32x8xf32> -> vector<32x8xf32>
    %91 = tpu.concatenate %88, %90 in 0 : vector<32x8xf32>, vector<32x8xf32> -> vector<64x8xf32>
    %c1_45 = arith.constant 1 : index
    %c0_46 = arith.constant 0 : index
    %c0_47 = arith.constant 0 : index
    %92 = vector.load %arg3[%c1_45, %c0_46, %c0_47] : memref<4x16x64xf32, #tpu.memory_space<vmem>>, vector<1x16x64xf32>
    %93 = vector.shape_cast %92 : vector<1x16x64xf32> to vector<16x64xf32>
    %c1_48 = arith.constant 1 : index
    %c0_49 = arith.constant 0 : index
    %c0_50 = arith.constant 0 : index
    %94 = vector.load %arg4[%c1_48, %c0_49, %c0_50] : memref<4x1x64xf32, #tpu.memory_space<vmem>>, vector<1x1x64xf32>
    %95 = vector.shape_cast %94 : vector<1x1x64xf32> to vector<1x64xf32>
    %96 = vector.broadcast %95 : vector<1x64xf32> to vector<16x64xf32>
    %97 = arith.mulf %93, %96 : vector<16x64xf32>
    %cst_51 = arith.constant dense<0.000000e+00> : vector<16x8xf32>
    %98 = tpu.matmul %97, %91, %cst_51 {dimension_numbers = #tpu.dot_dimension_numbers<[1], [0], [0], [1], [0, 0, 1, 1], [], []>} : vector<16x64xf32>, vector<64x8xf32>, vector<16x8xf32> -> vector<16x8xf32>
    %cst_52 = arith.constant dense<0.000000e+00> : vector<16x8xf32>
    %99 = tpu.matmul %83, %2, %cst_52 {dimension_numbers = #tpu.dot_dimension_numbers<[1], [0], [0], [1], [0, 0, 1, 1], [], []>} : vector<16x8xf32>, vector<8x8xf32>, vector<16x8xf32> -> vector<16x8xf32>
    %100 = arith.addf %98, %99 : vector<16x8xf32>
    %101 = vector.broadcast %3 : vector<1x8xf32> to vector<16x8xf32>
    %102 = arith.addf %100, %101 : vector<16x8xf32>
    %cst_53 = arith.constant 0.000000e+00 : f32
    %103 = vector.broadcast %cst_53 : f32 to vector<16x8xf32>
    %104 = arith.maximumf %102, %103 : vector<16x8xf32>
    %105 = vector.shape_cast %104 : vector<16x8xf32> to vector<1x16x8xf32>
    %cst_54 = arith.constant dense<0x7F800000> : vector<1xf32>
    %106 = vector.multi_reduction <minimumf>, %105, %cst_54 [1, 2] : vector<1x16x8xf32> to vector<1xf32>
    %107 = vector.shape_cast %106 : vector<1xf32> to vector<1x1x1xf32>
    %108 = vector.extract %107[0, 0, 0] : f32 from vector<1x1x1xf32>
    %109 = vector.broadcast %108 : f32 to vector<1x1xf32>
    %110 = vector.shape_cast %104 : vector<16x8xf32> to vector<1x16x8xf32>
    %cst_55 = arith.constant dense<0xFF800000> : vector<1xf32>
    %111 = vector.multi_reduction <maximumf>, %110, %cst_55 [1, 2] : vector<1x16x8xf32> to vector<1xf32>
    %112 = vector.shape_cast %111 : vector<1xf32> to vector<1x1x1xf32>
    %113 = vector.extract %112[0, 0, 0] : f32 from vector<1x1x1xf32>
    %114 = vector.broadcast %113 : f32 to vector<1x1xf32>
    %115 = vector.broadcast %109 : vector<1x1xf32> to vector<16x8xf32>
    %116 = arith.subf %104, %115 : vector<16x8xf32>
    %117 = arith.subf %114, %109 : vector<1x1xf32>
    %cst_56 = arith.constant 9.99999971E-10 : f32
    %118 = vector.broadcast %cst_56 : f32 to vector<1x1xf32>
    %119 = arith.addf %117, %118 : vector<1x1xf32>
    %120 = tpu.reciprocal %119 {approx = true} : vector<1x1xf32> -> vector<1x1xf32>
    %121 = vector.broadcast %120 : vector<1x1xf32> to vector<16x8xf32>
    %122 = arith.mulf %116, %121 : vector<16x8xf32>
    %cst_57 = arith.constant 3.14159274 : f32
    %123 = vector.broadcast %cst_57 : f32 to vector<16x8xf32>
    %124 = arith.mulf %122, %123 : vector<16x8xf32>
    %125 = math.cos %124 : vector<16x8xf32>
    %cst_58 = arith.constant dense<0.000000e+00> : vector<16x8xf32>
    %126 = tpu.matmul %125, %4, %cst_58 {dimension_numbers = #tpu.dot_dimension_numbers<[1], [0], [0], [1], [0, 0, 1, 1], [], []>} : vector<16x8xf32>, vector<8x8xf32>, vector<16x8xf32> -> vector<16x8xf32>
    %127 = vector.broadcast %5 : vector<1x8xf32> to vector<16x8xf32>
    %128 = arith.addf %126, %127 : vector<16x8xf32>
    %cst_59 = arith.constant 0.000000e+00 : f32
    %129 = vector.broadcast %cst_59 : f32 to vector<16x8xf32>
    %130 = arith.maximumf %128, %129 : vector<16x8xf32>
    %131 = tpu.iota {dimensions = array<i32: 1>} : vector<16x8xi32>
    %c5_i32_60 = arith.constant 5 : i32
    %132 = vector.broadcast %c5_i32_60 : i32 to vector<16x8xi32>
    %133 = arith.cmpi slt, %131, %132 : vector<16x8xi32>
    %cst_61 = arith.constant 0x7F800000 : f32
    %134 = vector.broadcast %cst_61 : f32 to vector<16x8xf32>
    %135 = arith.select %133, %130, %134 : vector<16x8xi1>, vector<16x8xf32>
    %cst_62 = arith.constant 0xFF800000 : f32
    %136 = vector.broadcast %cst_62 : f32 to vector<16x8xf32>
    %137 = arith.select %133, %130, %136 : vector<16x8xi1>, vector<16x8xf32>
    %138 = vector.shape_cast %135 : vector<16x8xf32> to vector<1x16x8xf32>
    %cst_63 = arith.constant dense<0x7F800000> : vector<1xf32>
    %139 = vector.multi_reduction <minimumf>, %138, %cst_63 [1, 2] : vector<1x16x8xf32> to vector<1xf32>
    %140 = vector.shape_cast %139 : vector<1xf32> to vector<1x1x1xf32>
    %141 = vector.extract %140[0, 0, 0] : f32 from vector<1x1x1xf32>
    %142 = vector.broadcast %141 : f32 to vector<1x1xf32>
    %143 = vector.shape_cast %137 : vector<16x8xf32> to vector<1x16x8xf32>
    %cst_64 = arith.constant dense<0xFF800000> : vector<1xf32>
    %144 = vector.multi_reduction <maximumf>, %143, %cst_64 [1, 2] : vector<1x16x8xf32> to vector<1xf32>
    %145 = vector.shape_cast %144 : vector<1xf32> to vector<1x1x1xf32>
    %146 = vector.extract %145[0, 0, 0] : f32 from vector<1x1x1xf32>
    %147 = vector.broadcast %146 : f32 to vector<1x1xf32>
    %148 = vector.broadcast %142 : vector<1x1xf32> to vector<16x8xf32>
    %149 = arith.subf %130, %148 : vector<16x8xf32>
    %150 = arith.subf %147, %142 : vector<1x1xf32>
    %cst_65 = arith.constant 9.99999971E-10 : f32
    %151 = vector.broadcast %cst_65 : f32 to vector<1x1xf32>
    %152 = arith.addf %150, %151 : vector<1x1xf32>
    %153 = vector.broadcast %152 : vector<1x1xf32> to vector<16x8xf32>
    %154 = arith.divf %149, %153 : vector<16x8xf32>
    %c1_66 = arith.constant 1 : index
    %c0_67 = arith.constant 0 : index
    %c0_68 = arith.constant 0 : index
    %155 = vector.load %arg6[%c1_66, %c0_67, %c0_68] : memref<4x16x8xf32, #tpu.memory_space<vmem>>, vector<1x16x8xf32>
    %156 = vector.shape_cast %155 : vector<1x16x8xf32> to vector<16x8xf32>
    %157 = vector.shape_cast %154 : vector<16x8xf32> to vector<1x16x8xf32>
    tpu.vector_store %arg6[%c1_66, %c0_67, %c0_68], %157 {strides = array<i32>} : memref<4x16x8xf32, #tpu.memory_space<vmem>>, vector<1x16x8xf32>,
    %c2 = arith.constant 2 : index
    %c0_69 = arith.constant 0 : index
    %c0_70 = arith.constant 0 : index
    %158 = vector.load %arg1[%c2, %c0_69, %c0_70] : memref<4x16x8xf32, #tpu.memory_space<vmem>>, vector<1x16x8xf32>
    %159 = vector.shape_cast %158 : vector<1x16x8xf32> to vector<16x8xf32>
    %c2_71 = arith.constant 2 : index
    %c0_72 = arith.constant 0 : index
    %c0_73 = arith.constant 0 : index
    %160 = vector.load %arg2[%c2_71, %c0_72, %c0_73] : memref<4x64x16xf32, #tpu.memory_space<vmem>>, vector<1x64x16xf32>
    %161 = vector.shape_cast %160 : vector<1x64x16xf32> to vector<64x16xf32>
    %cst_74 = arith.constant dense<0.000000e+00> : vector<64x8xf32>
    %162 = tpu.matmul %161, %159, %cst_74 {dimension_numbers = #tpu.dot_dimension_numbers<[1], [0], [0], [1], [0, 0, 1, 1], [], []>} : vector<64x16xf32>, vector<16x8xf32>, vector<64x8xf32> -> vector<64x8xf32>
    %163 = vector.extract_strided_slice %162 {offsets = [0, 0], sizes = [32, 8], strides = [1, 1]} : vector<64x8xf32> to vector<32x8xf32>
    %cst_75 = arith.constant dense<0.000000e+00> : vector<32x8xf32>
    %164 = tpu.matmul %163, %0, %cst_75 {dimension_numbers = #tpu.dot_dimension_numbers<[1], [0], [0], [1], [0, 0, 1, 1], [], []>} : vector<32x8xf32>, vector<8x8xf32>, vector<32x8xf32> -> vector<32x8xf32>
    %165 = vector.extract_strided_slice %162 {offsets = [32, 0], sizes = [32, 8], strides = [1, 1]} : vector<64x8xf32> to vector<32x8xf32>
    %cst_76 = arith.constant dense<0.000000e+00> : vector<32x8xf32>
    %166 = tpu.matmul %165, %1, %cst_76 {dimension_numbers = #tpu.dot_dimension_numbers<[1], [0], [0], [1], [0, 0, 1, 1], [], []>} : vector<32x8xf32>, vector<8x8xf32>, vector<32x8xf32> -> vector<32x8xf32>
    %167 = tpu.concatenate %164, %166 in 0 : vector<32x8xf32>, vector<32x8xf32> -> vector<64x8xf32>
    %c2_77 = arith.constant 2 : index
    %c0_78 = arith.constant 0 : index
    %c0_79 = arith.constant 0 : index
    %168 = vector.load %arg3[%c2_77, %c0_78, %c0_79] : memref<4x16x64xf32, #tpu.memory_space<vmem>>, vector<1x16x64xf32>
    %169 = vector.shape_cast %168 : vector<1x16x64xf32> to vector<16x64xf32>
    %c2_80 = arith.constant 2 : index
    %c0_81 = arith.constant 0 : index
    %c0_82 = arith.constant 0 : index
    %170 = vector.load %arg4[%c2_80, %c0_81, %c0_82] : memref<4x1x64xf32, #tpu.memory_space<vmem>>, vector<1x1x64xf32>
    %171 = vector.shape_cast %170 : vector<1x1x64xf32> to vector<1x64xf32>
    %172 = vector.broadcast %171 : vector<1x64xf32> to vector<16x64xf32>
    %173 = arith.mulf %169, %172 : vector<16x64xf32>
    %cst_83 = arith.constant dense<0.000000e+00> : vector<16x8xf32>
    %174 = tpu.matmul %173, %167, %cst_83 {dimension_numbers = #tpu.dot_dimension_numbers<[1], [0], [0], [1], [0, 0, 1, 1], [], []>} : vector<16x64xf32>, vector<64x8xf32>, vector<16x8xf32> -> vector<16x8xf32>
    %cst_84 = arith.constant dense<0.000000e+00> : vector<16x8xf32>
    %175 = tpu.matmul %159, %2, %cst_84 {dimension_numbers = #tpu.dot_dimension_numbers<[1], [0], [0], [1], [0, 0, 1, 1], [], []>} : vector<16x8xf32>, vector<8x8xf32>, vector<16x8xf32> -> vector<16x8xf32>
    %176 = arith.addf %174, %175 : vector<16x8xf32>
    %177 = vector.broadcast %3 : vector<1x8xf32> to vector<16x8xf32>
    %178 = arith.addf %176, %177 : vector<16x8xf32>
    %cst_85 = arith.constant 0.000000e+00 : f32
    %179 = vector.broadcast %cst_85 : f32 to vector<16x8xf32>
    %180 = arith.maximumf %178, %179 : vector<16x8xf32>
    %181 = vector.shape_cast %180 : vector<16x8xf32> to vector<1x16x8xf32>
    %cst_86 = arith.constant dense<0x7F800000> : vector<1xf32>
    %182 = vector.multi_reduction <minimumf>, %181, %cst_86 [1, 2] : vector<1x16x8xf32> to vector<1xf32>
    %183 = vector.shape_cast %182 : vector<1xf32> to vector<1x1x1xf32>
    %184 = vector.extract %183[0, 0, 0] : f32 from vector<1x1x1xf32>
    %185 = vector.broadcast %184 : f32 to vector<1x1xf32>
    %186 = vector.shape_cast %180 : vector<16x8xf32> to vector<1x16x8xf32>
    %cst_87 = arith.constant dense<0xFF800000> : vector<1xf32>
    %187 = vector.multi_reduction <maximumf>, %186, %cst_87 [1, 2] : vector<1x16x8xf32> to vector<1xf32>
    %188 = vector.shape_cast %187 : vector<1xf32> to vector<1x1x1xf32>
    %189 = vector.extract %188[0, 0, 0] : f32 from vector<1x1x1xf32>
    %190 = vector.broadcast %189 : f32 to vector<1x1xf32>
    %191 = vector.broadcast %185 : vector<1x1xf32> to vector<16x8xf32>
    %192 = arith.subf %180, %191 : vector<16x8xf32>
    %193 = arith.subf %190, %185 : vector<1x1xf32>
    %cst_88 = arith.constant 9.99999971E-10 : f32
    %194 = vector.broadcast %cst_88 : f32 to vector<1x1xf32>
    %195 = arith.addf %193, %194 : vector<1x1xf32>
    %196 = tpu.reciprocal %195 {approx = true} : vector<1x1xf32> -> vector<1x1xf32>
    %197 = vector.broadcast %196 : vector<1x1xf32> to vector<16x8xf32>
    %198 = arith.mulf %192, %197 : vector<16x8xf32>
    %cst_89 = arith.constant 3.14159274 : f32
    %199 = vector.broadcast %cst_89 : f32 to vector<16x8xf32>
    %200 = arith.mulf %198, %199 : vector<16x8xf32>
    %201 = math.cos %200 : vector<16x8xf32>
    %cst_90 = arith.constant dense<0.000000e+00> : vector<16x8xf32>
    %202 = tpu.matmul %201, %4, %cst_90 {dimension_numbers = #tpu.dot_dimension_numbers<[1], [0], [0], [1], [0, 0, 1, 1], [], []>} : vector<16x8xf32>, vector<8x8xf32>, vector<16x8xf32> -> vector<16x8xf32>
    %203 = vector.broadcast %5 : vector<1x8xf32> to vector<16x8xf32>
    %204 = arith.addf %202, %203 : vector<16x8xf32>
    %cst_91 = arith.constant 0.000000e+00 : f32
    %205 = vector.broadcast %cst_91 : f32 to vector<16x8xf32>
    %206 = arith.maximumf %204, %205 : vector<16x8xf32>
    %207 = tpu.iota {dimensions = array<i32: 1>} : vector<16x8xi32>
    %c5_i32_92 = arith.constant 5 : i32
    %208 = vector.broadcast %c5_i32_92 : i32 to vector<16x8xi32>
    %209 = arith.cmpi slt, %207, %208 : vector<16x8xi32>
    %cst_93 = arith.constant 0x7F800000 : f32
    %210 = vector.broadcast %cst_93 : f32 to vector<16x8xf32>
    %211 = arith.select %209, %206, %210 : vector<16x8xi1>, vector<16x8xf32>
    %cst_94 = arith.constant 0xFF800000 : f32
    %212 = vector.broadcast %cst_94 : f32 to vector<16x8xf32>
    %213 = arith.select %209, %206, %212 : vector<16x8xi1>, vector<16x8xf32>
    %214 = vector.shape_cast %211 : vector<16x8xf32> to vector<1x16x8xf32>
    %cst_95 = arith.constant dense<0x7F800000> : vector<1xf32>
    %215 = vector.multi_reduction <minimumf>, %214, %cst_95 [1, 2] : vector<1x16x8xf32> to vector<1xf32>
    %216 = vector.shape_cast %215 : vector<1xf32> to vector<1x1x1xf32>
    %217 = vector.extract %216[0, 0, 0] : f32 from vector<1x1x1xf32>
    %218 = vector.broadcast %217 : f32 to vector<1x1xf32>
    %219 = vector.shape_cast %213 : vector<16x8xf32> to vector<1x16x8xf32>
    %cst_96 = arith.constant dense<0xFF800000> : vector<1xf32>
    %220 = vector.multi_reduction <maximumf>, %219, %cst_96 [1, 2] : vector<1x16x8xf32> to vector<1xf32>
    %221 = vector.shape_cast %220 : vector<1xf32> to vector<1x1x1xf32>
    %222 = vector.extract %221[0, 0, 0] : f32 from vector<1x1x1xf32>
    %223 = vector.broadcast %222 : f32 to vector<1x1xf32>
    %224 = vector.broadcast %218 : vector<1x1xf32> to vector<16x8xf32>
    %225 = arith.subf %206, %224 : vector<16x8xf32>
    %226 = arith.subf %223, %218 : vector<1x1xf32>
    %cst_97 = arith.constant 9.99999971E-10 : f32
    %227 = vector.broadcast %cst_97 : f32 to vector<1x1xf32>
    %228 = arith.addf %226, %227 : vector<1x1xf32>
    %229 = vector.broadcast %228 : vector<1x1xf32> to vector<16x8xf32>
    %230 = arith.divf %225, %229 : vector<16x8xf32>
    %c2_98 = arith.constant 2 : index
    %c0_99 = arith.constant 0 : index
    %c0_100 = arith.constant 0 : index
    %231 = vector.load %arg6[%c2_98, %c0_99, %c0_100] : memref<4x16x8xf32, #tpu.memory_space<vmem>>, vector<1x16x8xf32>
    %232 = vector.shape_cast %231 : vector<1x16x8xf32> to vector<16x8xf32>
    %233 = vector.shape_cast %230 : vector<16x8xf32> to vector<1x16x8xf32>
    tpu.vector_store %arg6[%c2_98, %c0_99, %c0_100], %233 {strides = array<i32>} : memref<4x16x8xf32, #tpu.memory_space<vmem>>, vector<1x16x8xf32>,
    %c3 = arith.constant 3 : index
    %c0_101 = arith.constant 0 : index
    %c0_102 = arith.constant 0 : index
    %234 = vector.load %arg1[%c3, %c0_101, %c0_102] : memref<4x16x8xf32, #tpu.memory_space<vmem>>, vector<1x16x8xf32>
    %235 = vector.shape_cast %234 : vector<1x16x8xf32> to vector<16x8xf32>
    %c3_103 = arith.constant 3 : index
    %c0_104 = arith.constant 0 : index
    %c0_105 = arith.constant 0 : index
    %236 = vector.load %arg2[%c3_103, %c0_104, %c0_105] : memref<4x64x16xf32, #tpu.memory_space<vmem>>, vector<1x64x16xf32>
    %237 = vector.shape_cast %236 : vector<1x64x16xf32> to vector<64x16xf32>
    %cst_106 = arith.constant dense<0.000000e+00> : vector<64x8xf32>
    %238 = tpu.matmul %237, %235, %cst_106 {dimension_numbers = #tpu.dot_dimension_numbers<[1], [0], [0], [1], [0, 0, 1, 1], [], []>} : vector<64x16xf32>, vector<16x8xf32>, vector<64x8xf32> -> vector<64x8xf32>
    %239 = vector.extract_strided_slice %238 {offsets = [0, 0], sizes = [32, 8], strides = [1, 1]} : vector<64x8xf32> to vector<32x8xf32>
    %cst_107 = arith.constant dense<0.000000e+00> : vector<32x8xf32>
    %240 = tpu.matmul %239, %0, %cst_107 {dimension_numbers = #tpu.dot_dimension_numbers<[1], [0], [0], [1], [0, 0, 1, 1], [], []>} : vector<32x8xf32>, vector<8x8xf32>, vector<32x8xf32> -> vector<32x8xf32>
    %241 = vector.extract_strided_slice %238 {offsets = [32, 0], sizes = [32, 8], strides = [1, 1]} : vector<64x8xf32> to vector<32x8xf32>
    %cst_108 = arith.constant dense<0.000000e+00> : vector<32x8xf32>
    %242 = tpu.matmul %241, %1, %cst_108 {dimension_numbers = #tpu.dot_dimension_numbers<[1], [0], [0], [1], [0, 0, 1, 1], [], []>} : vector<32x8xf32>, vector<8x8xf32>, vector<32x8xf32> -> vector<32x8xf32>
    %243 = tpu.concatenate %240, %242 in 0 : vector<32x8xf32>, vector<32x8xf32> -> vector<64x8xf32>
    %c3_109 = arith.constant 3 : index
    %c0_110 = arith.constant 0 : index
    %c0_111 = arith.constant 0 : index
    %244 = vector.load %arg3[%c3_109, %c0_110, %c0_111] : memref<4x16x64xf32, #tpu.memory_space<vmem>>, vector<1x16x64xf32>
    %245 = vector.shape_cast %244 : vector<1x16x64xf32> to vector<16x64xf32>
    %c3_112 = arith.constant 3 : index
    %c0_113 = arith.constant 0 : index
    %c0_114 = arith.constant 0 : index
    %246 = vector.load %arg4[%c3_112, %c0_113, %c0_114] : memref<4x1x64xf32, #tpu.memory_space<vmem>>, vector<1x1x64xf32>
    %247 = vector.shape_cast %246 : vector<1x1x64xf32> to vector<1x64xf32>
    %248 = vector.broadcast %247 : vector<1x64xf32> to vector<16x64xf32>
    %249 = arith.mulf %245, %248 : vector<16x64xf32>
    %cst_115 = arith.constant dense<0.000000e+00> : vector<16x8xf32>
    %250 = tpu.matmul %249, %243, %cst_115 {dimension_numbers = #tpu.dot_dimension_numbers<[1], [0], [0], [1], [0, 0, 1, 1], [], []>} : vector<16x64xf32>, vector<64x8xf32>, vector<16x8xf32> -> vector<16x8xf32>
    %cst_116 = arith.constant dense<0.000000e+00> : vector<16x8xf32>
    %251 = tpu.matmul %235, %2, %cst_116 {dimension_numbers = #tpu.dot_dimension_numbers<[1], [0], [0], [1], [0, 0, 1, 1], [], []>} : vector<16x8xf32>, vector<8x8xf32>, vector<16x8xf32> -> vector<16x8xf32>
    %252 = arith.addf %250, %251 : vector<16x8xf32>
    %253 = vector.broadcast %3 : vector<1x8xf32> to vector<16x8xf32>
    %254 = arith.addf %252, %253 : vector<16x8xf32>
    %cst_117 = arith.constant 0.000000e+00 : f32
    %255 = vector.broadcast %cst_117 : f32 to vector<16x8xf32>
    %256 = arith.maximumf %254, %255 : vector<16x8xf32>
    %257 = vector.shape_cast %256 : vector<16x8xf32> to vector<1x16x8xf32>
    %cst_118 = arith.constant dense<0x7F800000> : vector<1xf32>
    %258 = vector.multi_reduction <minimumf>, %257, %cst_118 [1, 2] : vector<1x16x8xf32> to vector<1xf32>
    %259 = vector.shape_cast %258 : vector<1xf32> to vector<1x1x1xf32>
    %260 = vector.extract %259[0, 0, 0] : f32 from vector<1x1x1xf32>
    %261 = vector.broadcast %260 : f32 to vector<1x1xf32>
    %262 = vector.shape_cast %256 : vector<16x8xf32> to vector<1x16x8xf32>
    %cst_119 = arith.constant dense<0xFF800000> : vector<1xf32>
    %263 = vector.multi_reduction <maximumf>, %262, %cst_119 [1, 2] : vector<1x16x8xf32> to vector<1xf32>
    %264 = vector.shape_cast %263 : vector<1xf32> to vector<1x1x1xf32>
    %265 = vector.extract %264[0, 0, 0] : f32 from vector<1x1x1xf32>
    %266 = vector.broadcast %265 : f32 to vector<1x1xf32>
    %267 = vector.broadcast %261 : vector<1x1xf32> to vector<16x8xf32>
    %268 = arith.subf %256, %267 : vector<16x8xf32>
    %269 = arith.subf %266, %261 : vector<1x1xf32>
    %cst_120 = arith.constant 9.99999971E-10 : f32
    %270 = vector.broadcast %cst_120 : f32 to vector<1x1xf32>
    %271 = arith.addf %269, %270 : vector<1x1xf32>
    %272 = tpu.reciprocal %271 {approx = true} : vector<1x1xf32> -> vector<1x1xf32>
    %273 = vector.broadcast %272 : vector<1x1xf32> to vector<16x8xf32>
    %274 = arith.mulf %268, %273 : vector<16x8xf32>
    %cst_121 = arith.constant 3.14159274 : f32
    %275 = vector.broadcast %cst_121 : f32 to vector<16x8xf32>
    %276 = arith.mulf %274, %275 : vector<16x8xf32>
    %277 = math.cos %276 : vector<16x8xf32>
    %cst_122 = arith.constant dense<0.000000e+00> : vector<16x8xf32>
    %278 = tpu.matmul %277, %4, %cst_122 {dimension_numbers = #tpu.dot_dimension_numbers<[1], [0], [0], [1], [0, 0, 1, 1], [], []>} : vector<16x8xf32>, vector<8x8xf32>, vector<16x8xf32> -> vector<16x8xf32>
    %279 = vector.broadcast %5 : vector<1x8xf32> to vector<16x8xf32>
    %280 = arith.addf %278, %279 : vector<16x8xf32>
    %cst_123 = arith.constant 0.000000e+00 : f32
    %281 = vector.broadcast %cst_123 : f32 to vector<16x8xf32>
    %282 = arith.maximumf %280, %281 : vector<16x8xf32>
    %283 = tpu.iota {dimensions = array<i32: 1>} : vector<16x8xi32>
    %c5_i32_124 = arith.constant 5 : i32
    %284 = vector.broadcast %c5_i32_124 : i32 to vector<16x8xi32>
    %285 = arith.cmpi slt, %283, %284 : vector<16x8xi32>
    %cst_125 = arith.constant 0x7F800000 : f32
    %286 = vector.broadcast %cst_125 : f32 to vector<16x8xf32>
    %287 = arith.select %285, %282, %286 : vector<16x8xi1>, vector<16x8xf32>
    %cst_126 = arith.constant 0xFF800000 : f32
    %288 = vector.broadcast %cst_126 : f32 to vector<16x8xf32>
    %289 = arith.select %285, %282, %288 : vector<16x8xi1>, vector<16x8xf32>
    %290 = vector.shape_cast %287 : vector<16x8xf32> to vector<1x16x8xf32>
    %cst_127 = arith.constant dense<0x7F800000> : vector<1xf32>
    %291 = vector.multi_reduction <minimumf>, %290, %cst_127 [1, 2] : vector<1x16x8xf32> to vector<1xf32>
    %292 = vector.shape_cast %291 : vector<1xf32> to vector<1x1x1xf32>
    %293 = vector.extract %292[0, 0, 0] : f32 from vector<1x1x1xf32>
    %294 = vector.broadcast %293 : f32 to vector<1x1xf32>
    %295 = vector.shape_cast %289 : vector<16x8xf32> to vector<1x16x8xf32>
    %cst_128 = arith.constant dense<0xFF800000> : vector<1xf32>
    %296 = vector.multi_reduction <maximumf>, %295, %cst_128 [1, 2] : vector<1x16x8xf32> to vector<1xf32>
    %297 = vector.shape_cast %296 : vector<1xf32> to vector<1x1x1xf32>
    %298 = vector.extract %297[0, 0, 0] : f32 from vector<1x1x1xf32>
    %299 = vector.broadcast %298 : f32 to vector<1x1xf32>
    %300 = vector.broadcast %294 : vector<1x1xf32> to vector<16x8xf32>
    %301 = arith.subf %282, %300 : vector<16x8xf32>
    %302 = arith.subf %299, %294 : vector<1x1xf32>
    %cst_129 = arith.constant 9.99999971E-10 : f32
    %303 = vector.broadcast %cst_129 : f32 to vector<1x1xf32>
    %304 = arith.addf %302, %303 : vector<1x1xf32>
    %305 = vector.broadcast %304 : vector<1x1xf32> to vector<16x8xf32>
    %306 = arith.divf %301, %305 : vector<16x8xf32>
    %c3_130 = arith.constant 3 : index
    %c0_131 = arith.constant 0 : index
    %c0_132 = arith.constant 0 : index
    %307 = vector.load %arg6[%c3_130, %c0_131, %c0_132] : memref<4x16x8xf32, #tpu.memory_space<vmem>>, vector<1x16x8xf32>
    %308 = vector.shape_cast %307 : vector<1x16x8xf32> to vector<16x8xf32>
    %309 = vector.shape_cast %306 : vector<16x8xf32> to vector<1x16x8xf32>
    tpu.vector_store %arg6[%c3_130, %c0_131, %c0_132], %309 {strides = array<i32>} : memref<4x16x8xf32, #tpu.memory_space<vmem>>, vector<1x16x8xf32>,
    return
  }
  func.func @transform_0(%arg0: i32) -> (i32, i32, i32) {
    %c0_i32 = arith.constant 0 : i32
    %c0_i32_0 = arith.constant 0 : i32
    %c0_i32_1 = arith.constant 0 : i32
    return %arg0, %c0_i32, %c0_i32_0 : i32, i32, i32
  }
  func.func @transform_1(%arg0: i32) -> (i32, i32, i32) {
    %c0_i32 = arith.constant 0 : i32
    %c0_i32_0 = arith.constant 0 : i32
    %c0_i32_1 = arith.constant 0 : i32
    return %arg0, %c0_i32, %c0_i32_0 : i32, i32, i32
  }
  func.func @transform_2(%arg0: i32) -> (i32, i32, i32) {
    %c0_i32 = arith.constant 0 : i32
    %c0_i32_0 = arith.constant 0 : i32
    %c0_i32_1 = arith.constant 0 : i32
    return %arg0, %c0_i32, %c0_i32_0 : i32, i32, i32
  }
  func.func @transform_3(%arg0: i32) -> (i32, i32, i32) {
    %c0_i32 = arith.constant 0 : i32
    %c0_i32_0 = arith.constant 0 : i32
    %c0_i32_1 = arith.constant 0 : i32
    return %arg0, %c0_i32, %c0_i32_0 : i32, i32, i32
  }
  func.func @transform_4(%arg0: i32) -> (i32, i32) {
    %c0_i32 = arith.constant 0 : i32
    %c0_i32_0 = arith.constant 0 : i32
    %c0_i32_1 = arith.constant 0 : i32
    return %c0_i32, %c0_i32_0 : i32, i32
  }
  func.func @transform_5(%arg0: i32) -> (i32, i32, i32) {
    %c0_i32 = arith.constant 0 : i32
    %c0_i32_0 = arith.constant 0 : i32
    %c0_i32_1 = arith.constant 0 : i32
    return %arg0, %c0_i32, %c0_i32_0 : i32, i32, i32
  }
}

</mosaic_0001>

<bundles_post_ra>
// kernel: tpu_custom_call.1
= control target key start
LH: loop header
LB: loop body
LE: loop exit
PB: predicated region body
PF: predicated region fallthrough
CT: control target
= control target key end

     0   :  { %vm36_vm0 = vcmask 130048   ;;  %vm166_vm1 = vcmask 64512   ;;  %vm453_vm2 = vcmask 523264   ;;  %s5260_s0 = inlined_call_operand.vmem [shape: f32[4,16,8], index: 0, kind: input, shape index: {}]   ;;  %s5261_s1 = inlined_call_operand.vmem [shape: f32[4,64,16], index: 1, kind: input, shape index: {}]   ;;  %s5262_s4 = inlined_call_operand.vmem [shape: f32[48,8], index: 4, kind: input, shape index: {}]   ;;  %s5263_s2 = inlined_call_operand.vmem [shape: f32[4,16,64], index: 2, kind: input, shape index: {}]   ;;  %s5264_s3 = inlined_call_operand.vmem [shape: f32[4,1,64], index: 3, kind: input, shape index: {}]   ;;  %s5265_s5 = inlined_call_operand.vmem [shape: f32[4,16,8], index: 5, kind: output, shape index: {}]  }
   0x1   :  { %v26_v0 = vld [vmem:[%s5260_s0] sm:$0xff]  ;;  %v27_v1 = vld [vmem:[%s5260_s0 + $0x8] sm:$0xff]  ;;  %v30_v5 = vld [vmem:[%s5261_s1 + $0x10] sm:$0xff] }
   0x2   :  { %v28_v2 = vld [vmem:[%s5261_s1] sm:$0xff]  ;;  %v4110_v3 = vpack.c.bf16 %v27_v1, %v26_v0  ;;  %v29_v4 = vld [vmem:[%s5261_s1 + $0x8] sm:$0xff]  ;;  %v31_v6 = vld [vmem:[%s5261_s1 + $0x18] sm:$0xff] }
   0x3   :  { %3870 = vmatprep.mubr.msk.f32.mxu0 %vm36_vm0, %v28_v2  ;;  %v32_v7 = vld [vmem:[%s5261_s1 + $0x20] sm:$0xff]  ;;  %v33_v8 = vld [vmem:[%s5261_s1 + $0x28] sm:$0xff]  ;;  %v34_v9 = vld [vmem:[%s5261_s1 + $0x30] sm:$0xff] }
   0x4   :  { %4111 = vmatprep.subr.bf16.mxu0 %v4110_v3  ;;  %v35_v10 = vld [vmem:[%s5261_s1 + $0x38] sm:$0xff]  ;;  %v4399_v11 = vld [vmem:[%s5262_s4] sm:$0xff]  ;;  %v4406_v12 = vld [vmem:[%s5262_s4 + $0x8] sm:$0xff] }
   0x5   :  { %4113 = vmatpush3.bf16.msra.mxu0 %v4110_v3  ;;  %3882 = vmatprep.subr.mxu1 %v4399_v11  ;;  %v4422_v21 = vld [vmem:[%s5262_s4 + $0x10] sm:$0xff]  ;;  %v361_v22 = vld [vmem:[%s5263_s2] sm:$0xff]  ;;  %v362_v36 = vld [vmem:[%s5263_s2 + $0x8] sm:$0xff] }
   0x6   :  { %3883 = vmatpush3.msra.mxu1 %v4399_v11  ;;  %v3567_v23 = vld [vmem:[%s5264_s3] ss:$0 sm:$0xff]  ;;  %v4441_v41 = vld [vmem:[%s5260_s0 + $0x10] sm:$0xff]  ;;  %v4446_v42 = vld [vmem:[%s5260_s0 + $0x18] sm:$0xff] }
   0x7   :  { %3890 = vmatprep.subr.mxu1 %v4406_v12  ;;  %v370_v24 = vmul.f32 %v3567_v23, %v361_v22  ;;  %v371_v38 = vmul.f32 %v3567_v23, %v362_v36  ;;  %v3586_v43 = vld [vmem:[%s5261_s1 + $0x40] sm:$0xff]  ;;  %v4130_v44 = vpack.c.bf16 %v4446_v42, %v4441_v41  ;;  %v3587_v45 = vld [vmem:[%s5261_s1 + $0x48] sm:$0xff]  ;;  %v3588_v46 = vld [vmem:[%s5261_s1 + $0x50] sm:$0xff] }
   0x8   :  { %3871 = vmatmul.mubr.msk.f32.vlgmr.msra.gmra.mrb[0].mxu0 %vm36_vm0, %v29_v4  ;;  %v3589_v47 = vld [vmem:[%s5261_s1 + $0x58] sm:$0xff]  ;;  %v3590_v48 = vld [vmem:[%s5261_s1 + $0x60] sm:$0xff]  ;;  %v3591_v49 = vld [vmem:[%s5261_s1 + $0x68] sm:$0xff] }
   0x9   :  { %3873 = vmatprep.mubr.msk.f32.mxu0 %vm36_vm0, %v30_v5  ;;  %v3592_v50 = vld [vmem:[%s5261_s1 + $0x70] sm:$0xff]  ;;  %v3593_v51 = vld [vmem:[%s5261_s1 + $0x78] sm:$0xff]  ;;  %v24_v3 = vld [vmem:[%s5262_s4 + $0x20] sm:$0xff] }
   0xa   :  { %v4487_v52 = vld [vmem:[%s5262_s4 + $0x18] ss:$0 sm:$0xff] }
   0xc   :  { %3874 = vmatmul.mubr.msk.f32.gmra.mrb[2].mxu0 %vm36_vm0, %v31_v6 }
   0xd   :  { %3876 = vmatprep.mubr.msk.f32.mxu0 %vm36_vm0, %v32_v7 }
  0x10   :  { %3877 = vmatmul.mubr.msk.f32.gmra.mrb[4].mxu0 %vm36_vm0, %v33_v8 }
  0x11   :  { %3879 = vmatprep.mubr.msk.f32.mxu0 %vm36_vm0, %v34_v9 }
  0x14   :  { %3880 = vmatmul.mubr.msk.f32.gmra.mrb[6].mxu0 %vm36_vm0, %v35_v10 }
  0x15   :  { %3919 = vmatprep.mubr.msk.f32.mxu0 %vm453_vm2, %v370_v24 }
  0xdb   :  { %v3872_v13 = vpop.f32.mrb[0].mxu0 }
  0xdc   :  { %v127_v14 = vpop.f32.mrb[1].mxu0 }
  0xdd   :  { %3884 = vmatprep.mubr.msk.f32.mxu1 %vm166_vm1, %v127_v14 }
  0xde   :  { %3885 = vmatmul.mubr.msk.f32.vlgmr.msra.gmra.mrb[0].mxu1 %vm166_vm1, %v3872_v13 }
  0xdf   :  { %v3875_v15 = vpop.f32.mrb[2].mxu0  ;;  %3891 = vmatpush3.msra.mxu1 %v4406_v12 }
  0xe0   :  { %v137_v16 = vpop.f32.mrb[3].mxu0  ;;  %3898 = vmatprep.subr.mxu1 %v4422_v21 }
  0xe1   :  { %3887 = vmatprep.mubr.msk.f32.mxu1 %vm166_vm1, %v137_v16 }
  0xe2   :  { %3888 = vmatmul.mubr.msk.f32.gmra.mrb[2].mxu1 %vm166_vm1, %v3875_v15 }
  0xe3   :  { %v3878_v17 = vpop.f32.mrb[4].mxu0 }
  0xe4   :  { %v147_v18 = vpop.f32.mrb[5].mxu0 }
  0xe5   :  { %3892 = vmatprep.mubr.msk.f32.mxu1 %vm166_vm1, %v147_v18 }
  0xe6   :  { %3893 = vmatmul.mubr.msk.f32.vlgmr.msra.gmra.mrb[4].mxu1 %vm166_vm1, %v3878_v17 }
  0xe7   :  { %v3881_v19 = vpop.f32.mrb[6].mxu0  ;;  %3899 = vmatpush3.msra.mxu1 %v4422_v21 }
  0xe8   :  { %v157_v20 = vpop.f32.mrb[7].mxu0  ;;  %3922 = vmatprep.subr.mxu1 %v24_v3 }
  0xe9   :  { %3895 = vmatprep.mubr.msk.f32.mxu1 %vm166_vm1, %v157_v20 }
  0xea   :  { %3896 = vmatmul.mubr.msk.f32.gmra.mrb[6].mxu1 %vm166_vm1, %v3881_v19 }
  0xeb   :  { %3900 = vmatprep.mubr.msk.f32.mxu1 %vm166_vm1, %v26_v0 }
  0xee   :  { %3901 = vmatmul.mubr.msk.f32.vlgmr.msra.gmra.mrb[8].mxu1 %vm166_vm1, %v27_v1 }
  0xef   :  { %3923 = vmatpush3.msra.mxu1 %v24_v3 }
  0xf0   :  { %3943 = vmatprep.subr.mxu1 %v4399_v11 }
 0x1b1   :  { %v3886_v25 = vpop.f32.mrb[0].mxu1 }
 0x1b2   :  { %v245_v26 = vpop.f32.mrb[1].mxu1 }
 0x1b3   :  { %v4114_v27 = vpack.c.bf16 %v3886_v25, %v245_v26 }
 0x1b5   :  { %v3889_v28 = vpop.f32.mrb[2].mxu1  ;;  %4115 = vmatprep.subr.bf16.mxu0 %v4114_v27 }
 0x1b6   :  { %v255_v29 = vpop.f32.mrb[3].mxu1  ;;  %4117 = vmatpush3.bf16.msra.mxu0 %v4114_v27 }
 0x1b7   :  { %v4118_v30 = vpack.c.bf16 %v3889_v28, %v255_v29 }
 0x1b9   :  { %v3894_v31 = vpop.f32.mrb[4].mxu1  ;;  %4119 = vmatprep.subr.bf16.mxu0 %v4118_v30 }
 0x1ba   :  { %v342_v32 = vpop.f32.mrb[5].mxu1  ;;  %4121 = vmatpush3.bf16.msra.mxu0 %v4118_v30 }
 0x1bb   :  { %v4122_v33 = vpack.c.bf16 %v3894_v31, %v342_v32 }
 0x1bd   :  { %v3897_v34 = vpop.f32.mrb[6].mxu1  ;;  %4123 = vmatprep.subr.bf16.mxu0 %v4122_v33 }
 0x1be   :  { %v352_v35 = vpop.f32.mrb[7].mxu1  ;;  %4125 = vmatpush3.bf16.msra.mxu0 %v4122_v33 }
 0x1bf   :  { %v4126_v37 = vpack.c.bf16 %v3897_v34, %v352_v35 }
 0x1c1   :  { %4127 = vmatprep.subr.bf16.mxu0 %v4126_v37  ;;  %v3902_v39 = vpop.f32.mrb[8].mxu1 }
 0x1c2   :  { %4129 = vmatpush3.bf16.msra.mxu0 %v4126_v37  ;;  %v444_v40 = vpop.f32.mrb[9].mxu1 }
 0x1c3   :  { %4131 = vmatprep.subr.bf16.mxu0 %v4130_v44 }
 0x1c5   :  { %3920 = vmatmul.mubr.msk.f32.vlgmr.msra.gmra.mrb[8].mxu0 %vm453_vm2, %v371_v38 }
 0x1c6   :  { %3931 = vmatprep.mubr.msk.f32.mxu0 %vm36_vm0, %v3586_v43  ;;  %4133 = vmatpush3.bf16.msra.mxu0 %v4130_v44 }
 0x1c7   :  { %3951 = vmatprep.subr.mxu0 %v4406_v12 }
 0x1c9   :  { %3932 = vmatmul.mubr.msk.f32.vlgmr.msra.gmra.mrb[10].mxu0 %vm36_vm0, %v3587_v45 }
 0x1ca   :  { %3934 = vmatprep.mubr.msk.f32.mxu0 %vm36_vm0, %v3588_v46  ;;  %3952 = vmatpush3.msra.mxu0 %v4406_v12 }
 0x1cb   :  { %3983 = vmatprep.subr.mxu0 %v24_v3 }
 0x1cd   :  { %3935 = vmatmul.mubr.msk.f32.gmra.mrb[12].mxu0 %vm36_vm0, %v3589_v47 }
 0x1ce   :  { %3937 = vmatprep.mubr.msk.f32.mxu0 %vm36_vm0, %v3590_v48 }
 0x1d1   :  { %3938 = vmatmul.mubr.msk.f32.gmra.mrb[14].mxu0 %vm36_vm0, %v3591_v49 }
 0x1d2   :  { %3940 = vmatprep.mubr.msk.f32.mxu0 %vm36_vm0, %v3592_v50 }
 0x1d5   :  { %3941 = vmatmul.mubr.msk.f32.gmra.mrb[16].mxu0 %vm36_vm0, %v3593_v51 }
 0x298   :  { %v3921_v53 = vpop.f32.mrb[8].mxu0 }
 0x299   :  { %v532_v54 = vadd.f32 %v3921_v53, %v3902_v39  ;;  %v526_v55 = vpop.f32.mrb[9].mxu0 }
 0x29a   :  { %v527_v56 = vadd.f32 %v526_v55, %v444_v40 }
 0x29b   :  { %v540_v57 = vadd.f32 %v4487_v52, %v532_v54 }
 0x29c   :  { %v539_v58 = vadd.f32 %v4487_v52, %v527_v56  ;;  %v4499_v19 = vpop.f32.mrb[10].mxu0 }
 0x29d   :  { %v542_v59 = vmax.f32 %v540_v57, 0.0  ;;  %v4501_v20 = vpop.f32.mrb[11].mxu0 }
 0x29e   :  { %v541_v60 = vmax.f32 %v539_v58, 0.0 }
 0x29f   :  { %v544_v61 = vsel %vm166_vm1, %v542_v59, inf  ;;  %v557_v1 = vsel %vm166_vm1, %v542_v59, -inf }
 0x2a0   :  { %v543_v62 = vsel %vm166_vm1, %v541_v60, inf  ;;  %v556_v0 = vsel %vm166_vm1, %v541_v60, -inf  ;;  %v4503_v22 = vpop.f32.mrb[12].mxu0 }
 0x2a1   :  { %v545_v63 = vmin.f32 %v543_v62, %v544_v61  ;;  %v558_v2 = vmax.f32 %v556_v0, %v557_v1  ;;  %v4505_v23 = vpop.f32.mrb[13].mxu0 }
 0x2a3   :  { %546 = vmin.xlane.f32.xlu0 %v545_v63 }
 0x2a4   :  { %v3939_v24 = vpop.f32.mrb[14].mxu0 }
 0x2a5   :  { %v1035_v25 = vpop.f32.mrb[15].mxu0 }
 0x2a6   :  { %3953 = vmatprep.mubr.msk.f32.mxu0 %vm166_vm1, %v1035_v25 }
 0x2a7   :  { %559 = vmax.xlane.f32.xlu0 %v558_v2  ;;  %3954 = vmatmul.mubr.msk.f32.vlgmr.msra.gmra.mrb[18].mxu0 %vm166_vm1, %v3939_v24  ;;  %v4322_v2 = vmov 683565275  }
 0x2a8   :  { %v3942_v26 = vpop.f32.mrb[16].mxu0  ;;  %3984 = vmatpush3.msra.mxu0 %v24_v3 }
 0x2a9   :  { %v1045_v27 = vpop.f32.mrb[17].mxu0 }
 0x2aa   :  { %3956 = vmatprep.mubr.msk.f32.mxu0 %vm166_vm1, %v1045_v27 }
 0x2ab   :  { %3957 = vmatmul.mubr.msk.f32.gmra.mrb[20].mxu0 %vm166_vm1, %v3942_v26 }
 0x330   :  { %v547_v4 = vpop.xlane.xlu0 %546 }
 0x331   :  { %v548_v5 = vrot.slane %v547_v4, 4 }
 0x333   :  { %v549_v6 = vmin.f32 %v547_v4, %v548_v5  ;;  %v4323_v4 = vmov 2475754826  }
 0x334   :  { %v560_v7 = vpop.xlane.xlu0 %559 }
 0x335   :  { %v550_v8 = vrot.slane %v549_v6, 2  ;;  %v561_v9 = vrot.slane %v560_v7, 4 }
 0x337   :  { %v562_v10 = vmax.f32 %v560_v7, %v561_v9  ;;  %v551_v12 = vmin.f32 %v549_v6, %v550_v8  ;;  %v4324_v6 = vmov 2131351028  }
 0x339   :  { %v563_v13 = vrot.slane %v562_v10, 2  ;;  %v552_v14 = vrot.slane %v551_v12, 1 }
 0x33b   :  { %v553_v15 = vmin.f32 %v551_v12, %v552_v14  ;;  %v564_v16 = vmax.f32 %v562_v10, %v563_v13  ;;  %v4325_v10 = vmov 2102212464   ;;  %v4326_v14 = vmov 920167782  }
 0x33d   :  { %4198 = vpush %v553_v15  ;;  %v565_v17 = vrot.slane %v564_v16, 1 }
 0x33f   :  { %v566_v18 = vmax.f32 %v564_v16, %v565_v17  ;;  %v4327_v17 = vmov 1326507024  }
 0x341   :  { %4200 = vpush %v566_v18 }
 0x36e   :  { %s4199_s24 = spop %4198 }
 0x36f   :  { %v555_v28 = vstv %s4199_s24 }
 0x370   :  { %v569_v32 = vsub.f32 %v541_v60, %v555_v28  ;;  %v570_v33 = vsub.f32 %v542_v59, %v555_v28 }
 0x372   :  { %s4201_s25 = spop %4200 }
 0x373   :  { %v568_v29 = vstv %s4201_s25 }
 0x374   :  { %v571_v30 = vsub.f32 %v568_v29, %v555_v28 }
 0x376   :  { %v572_v31 = vadd.f32 1e-09, %v571_v30 }
 0x378   :  { %4268 = vrcp.f32 %v572_v31 }
 0x382   :  { %v4269_v34 = vpop.eup %4268 }
 0x383   :  { %v574_v35 = vmul.f32 %v4269_v34, %v569_v32  ;;  %v575_v36 = vmul.f32 %v4269_v34, %v570_v33 }
 0x385   :  { %v4511_v37 = vmul.f32 3.1415927, %v574_v35  ;;  %v4513_v38 = vmul.f32 3.1415927, %v575_v36 }
 0x387   :  { %v581_v39 = vand.u32 2139095040, %v4511_v37  ;;  %v684_v40 = vand.u32 2139095040, %v4513_v38  ;;  %v578_v43 = vand.u32 2147483647, %v4511_v37  ;;  %v681_v44 = vand.u32 2147483647, %v4513_v38 }
 0x389   :  { %v582_v45 = vshrl.u32 %v581_v39, 23  ;;  %v685_v46 = vshrl.u32 %v684_v40, 23  ;;  %v585_v49 = vand.u32 8388607, %v578_v43  ;;  %v688_v50 = vand.u32 8388607, %v681_v44 }
 0x38b   :  { %v3573_v47 = vadd.s32 4294967169, %v582_v45  ;;  %v3577_v48 = vadd.s32 4294967169, %v685_v46  ;;  %v586_v54 = vor.u32 8388608, %v585_v49  ;;  %v689_v55 = vor.u32 8388608, %v688_v50 }
 0x38d   :  { %v588_v51 = vadd.s32 1, %v3573_v47  ;;  %v691_v53 = vadd.s32 1, %v3577_v48  ;;  %v4527_v63 = vshll.u32 %v586_v54, 8  ;;  %v4529_v0 = vshll.u32 %v689_v55, 8 }
 0x38f   :  { %vm589_vm3 = vcmp.gt.s32.totalorder %v588_v51, 0  ;;  %vm692_vm4 = vcmp.gt.s32.totalorder %v691_v53, 0 }
 0x390   :  { %v590_v56 = vsel %vm589_vm3, %v588_v51, 0  ;;  %v693_v57 = vsel %vm692_vm4, %v691_v53, 0  ;;  %vm580_vm4 = vcmp.lt.s32.totalorder %v4511_v37, 0 }
 0x391   :  { %v592_v58 = vand.u32 31, %v590_v56  ;;  %v4523_v59 = vand.u32 31, %v693_v57  ;;  %v591_v60 = vshrl.u32 %v590_v56, 5  ;;  %v4525_v61 = vshrl.u32 %v693_v57, 5 }
 0x393   :  { %v593_v62 = vsub.s32 32, %v592_v58  ;;  %v696_v1 = vsub.s32 32, %v4523_v59  ;;  %v595_v3 = vshll.u32 %v4322_v2, %v592_v58  ;;  %v598_v5 = vshll.u32 %v4323_v4, %v592_v58 }
 0x394   :  { %v601_v7 = vshll.u32 %v4324_v6, %v592_v58  ;;  %v604_v13 = vshll.u32 %v4325_v10, %v592_v58  ;;  %v607_v16 = vshll.u32 %v4326_v14, %v592_v58  ;;  %vm610_vm5 = vcmp.lt.s32.totalorder %v591_v60, 1 }
 0x395   :  { %v596_v8 = vshrl.u32 %v4323_v4, %v593_v62  ;;  %v599_v9 = vshrl.u32 %v4324_v6, %v593_v62  ;;  %v602_v12 = vshrl.u32 %v4325_v10, %v593_v62  ;;  %v605_v15 = vshrl.u32 %v4326_v14, %v593_v62 }
 0x396   :  { %v608_v18 = vshrl.u32 %v4327_v17, %v593_v62  ;;  %v594_v24 = vshrl.u32 %v4322_v2, %v593_v62  ;;  %vm612_vm6 = vcmp.lt.s32.totalorder %v591_v60, 3  ;;  %vm613_vm7 = vcmp.lt.s32.totalorder %v591_v60, 4 }
 0x397   :  { %v597_v25 = vor.u32 %v596_v8, %v595_v3  ;;  %v600_v26 = vor.u32 %v599_v9, %v598_v5  ;;  %v603_v27 = vor.u32 %v602_v12, %v601_v7  ;;  %v606_v28 = vor.u32 %v605_v15, %v604_v13 }
 0x398   :  { %v609_v29 = vor.u32 %v608_v18, %v607_v16  ;;  %v699_v39 = vshrl.u32 %v4323_v4, %v696_v1  ;;  %vm611_vm8 = vcmp.lt.s32.totalorder %v591_v60, 2  ;;  %v698_v46 = vshll.u32 %v4322_v2, %v4523_v59 }
 0x399   :  { %v614_v30 = vsel %vm610_vm5, %v594_v24, %v597_v25  ;;  %v615_v31 = vsel %vm613_vm7, %v603_v27, 2102212464  ;;  %v618_v32 = vsel %vm610_vm5, %v597_v25, %v600_v26  ;;  %v622_v33 = vsel %vm610_vm5, %v600_v26, %v603_v27 }
 0x39a   :  { %v616_v34 = vsel %vm612_vm6, %v600_v26, %v615_v31  ;;  %v619_v35 = vsel %vm613_vm7, %v606_v28, 920167782  ;;  %v623_v36 = vsel %vm613_vm7, %v609_v29, 1326507024  ;;  %v701_v50 = vshll.u32 %v4323_v4, %v4523_v59 }
 0x39b   :  { %v620_v40 = vsel %vm612_vm6, %v603_v27, %v619_v35  ;;  %v624_v45 = vsel %vm612_vm6, %v606_v28, %v623_v36  ;;  %v617_v47 = vsel %vm611_vm8, %v614_v30, %v616_v34  ;;  %v700_v56 = vor.u32 %v699_v39, %v698_v46 }
 0x39c   :  { %v621_v48 = vsel %vm611_vm8, %v618_v32, %v620_v40  ;;  %v625_v49 = vsel %vm611_vm8, %v622_v33, %v624_v45  ;;  %v702_v57 = vshrl.u32 %v4324_v6, %v696_v1  ;;  %v704_v58 = vshll.u32 %v4324_v6, %v4523_v59 }
 0x39d   :  { %v4549_v51 = vmul.u32.u64.low %v4527_v63, %v625_v49  ;;  %v4550_v53 = vmul.u32.u64.high %v4527_v63, %v625_v49, %v4549_v51  ;;  %v4553_v54 = vmul.u32.u64.low %v4527_v63, %v621_v48  ;;  %v4554_v55 = vmul.u32.u64.high %v4527_v63, %v621_v48, %v4553_v54 }
 0x39e   :  { %v705_v60 = vshrl.u32 %v4325_v10, %v696_v1  ;;  %v697_v62 = vshrl.u32 %v4322_v2, %v696_v1  ;;  %v707_v3 = vshll.u32 %v4325_v10, %v4523_v59  ;;  %v708_v5 = vshrl.u32 %v4326_v14, %v696_v1 }
 0x39f   :  { %v711_v7 = vshrl.u32 %v4327_v17, %v696_v1  ;;  %v633_v8 = vmul.u32 %v4527_v63, %v617_v47  ;;  %v703_v9 = vor.u32 %v702_v57, %v701_v50  ;;  %v710_v13 = vshll.u32 %v4326_v14, %v4523_v59 }
 0x3a0   :  { %v706_v12 = vor.u32 %v705_v60, %v704_v58  ;;  %vm635_vm9 = vc.u32 %v4550_v53, %v4553_v54  ;;  %v636_v15 = vadd.s32 1, %v4554_v55  ;;  %v709_v16 = vor.u32 %v708_v5, %v707_v3 }
 0x3a1   :  { %vm713_vm10 = vcmp.lt.s32.totalorder %v4525_v61, 1  ;;  %v712_v18 = vor.u32 %v711_v7, %v710_v13  ;;  %vm715_vm11 = vcmp.lt.s32.totalorder %v4525_v61, 3  ;;  %vm716_vm12 = vcmp.lt.s32.totalorder %v4525_v61, 4 }
 0x3a2   :  { %v721_v1 = vsel %vm713_vm10, %v700_v56, %v703_v9  ;;  %v637_v63 = vsel %vm635_vm9, %v636_v15, %v4554_v55  ;;  %v718_v24 = vsel %vm716_vm12, %v706_v12, 2102212464  ;;  %v722_v25 = vsel %vm716_vm12, %v709_v16, 920167782 }
 0x3a3   :  { %v725_v26 = vsel %vm713_vm10, %v703_v9, %v706_v12  ;;  %v638_v27 = vadd.s32 %v637_v63, %v633_v8  ;;  %vm714_vm13 = vcmp.lt.s32.totalorder %v4525_v61, 2  ;;  %v723_v59 = vsel %vm715_vm11, %v706_v12, %v722_v25 }
 0x3a4   :  { %v726_v28 = vsel %vm716_vm12, %v712_v18, 1326507024  ;;  %v717_v29 = vsel %vm713_vm10, %v697_v62, %v700_v56  ;;  %v719_v30 = vsel %vm715_vm11, %v703_v9, %v718_v24  ;;  %v724_v31 = vsel %vm714_vm13, %v721_v1, %v723_v59 }
 0x3a5   :  { %v727_v32 = vsel %vm715_vm11, %v709_v16, %v726_v28  ;;  %v639_v33 = vadd.s32 536870912, %v638_v27  ;;  %v4576_v35 = vmul.u32.u64.low %v4529_v0, %v724_v31  ;;  %v4577_v36 = vmul.u32.u64.high %v4529_v0, %v724_v31, %v4576_v35 }
 0x3a6   :  { %v728_v34 = vsel %vm714_vm13, %v725_v26, %v727_v32  ;;  %v720_v46 = vsel %vm714_vm13, %v717_v29, %v719_v30  ;;  %v634_v9 = vadd.s32 %v4553_v54, %v4550_v53  ;;  %vm4592_vm5 = vcmp.le.f32.partialorder %v578_v43, 0.7853982 }
 0x3a7   :  { %v4580_v39 = vmul.u32.u64.low %v4529_v0, %v728_v34  ;;  %v4581_v40 = vmul.u32.u64.high %v4529_v0, %v728_v34, %v4580_v39  ;;  %v640_v45 = vshrl.u32 %v639_v33, 30  ;;  %v739_v61 = vadd.s32 1, %v4577_v36 }
 0x3a8   :  { %v736_v48 = vmul.u32 %v4529_v0, %v720_v46  ;;  %vm683_vm6 = vcmp.lt.s32.totalorder %v4513_v38, 0  ;;  %vm4604_vm7 = vcmp.le.f32.partialorder %v681_v44, 0.7853982  ;;  %vm670_vm11 = vweird.f32 %v4511_v37 }
 0x3a9   :  { %v641_v47 = vshll.u32 %v640_v45, 30  ;;  %vm738_vm14 = vc.u32 %v4581_v40, %v4576_v35  ;;  %v737_v29 = vadd.s32 %v4576_v35, %v4581_v40 }
 0x3aa   :  { %v740_v50 = vsel %vm738_vm14, %v739_v61, %v4577_v36  ;;  %v664_v61 = vsub.s32 4, %v640_v45 }
 0x3ab   :  { %v642_v49 = vsub.s32 %v638_v27, %v641_v47  ;;  %v741_v51 = vadd.s32 %v740_v50, %v736_v48 }
 0x3ac   :  { %v665_v50 = vsel %vm580_vm4, %v664_v61, %v640_v45 }
 0x3ad   :  { %v644_v55 = vsub.s32 0, %v642_v49  ;;  %v742_v56 = vadd.s32 536870912, %v741_v51 }
 0x3af   :  { %v3574_v57 = vmin.u32 %v644_v55, %v642_v49  ;;  %v743_v58 = vshrl.u32 %v742_v56, 30  ;;  %v667_v55 = vsel %vm4592_vm5, 0, %v665_v50 }
 0x3b1   :  { %v646_v60 = vclz %v3574_v57  ;;  %v744_v62 = vshll.u32 %v743_v58, 30 }
 0x3b3   :  { %v3575_v3 = vadd.s32 4294967294, %v646_v60  ;;  %v745_v5 = vsub.s32 %v741_v51, %v744_v62  ;;  %v767_v60 = vsub.s32 4, %v743_v58  ;;  %v671_v62 = vand.u32 3, %v667_v55 }
 0x3b5   :  { %vm3576_vm15 = vcmp.lt.s32.totalorder %v3575_v3, 0  ;;  %v747_v8 = vsub.s32 0, %v745_v5  ;;  %vm676_vm8 = vcmp.eq.s32.totalorder %v671_v62, 2  ;;  %vm673_vm9 = vcmp.eq.s32.totalorder %v671_v62, 0 }
 0x3b6   :  { %v649_v7 = vsel %vm3576_vm15, 0, %v3575_v3  ;;  %vm672_vm10 = vcmp.lt.s32.totalorder %v671_v62, 2  ;;  %vm773_vm15 = vweird.f32 %v4513_v38  ;;  %v3611_v62 = vld [vmem:[%s5263_s2 + $0x18] sm:$0xff] }
 0x3b7   :  { %v650_v0 = vsub.s32 32, %v649_v7  ;;  %v654_v12 = vsub.s32 4294967266, %v649_v7  ;;  %v3578_v13 = vmin.u32 %v747_v8, %v745_v5  ;;  %v651_v15 = vshll.u32 %v642_v49, %v649_v7 }
 0x3b8   :  { %v768_v8 = vsel %vm683_vm6, %v767_v60, %v743_v58 }
 0x3b9   :  { %v652_v16 = vshrl.u32 %v634_v9, %v650_v0  ;;  %v655_v18 = vadd.s32 127, %v654_v12  ;;  %v749_v1 = vclz %v3578_v13  ;;  %v770_v12 = vsel %vm4604_vm7, 0, %v768_v8 }
 0x3bb   :  { %v653_v63 = vor.u32 %v652_v16, %v651_v15  ;;  %v656_v24 = vshll.u32 %v655_v18, 23  ;;  %v3579_v25 = vadd.s32 4294967294, %v749_v1  ;;  %v774_v16 = vand.u32 3, %v770_v12 }
 0x3bd   :  { %v657_v26 = vor.u32 4788187, %v656_v24  ;;  %vm3580_vm3 = vcmp.lt.s32.totalorder %v3579_v25, 0  ;;  %v660_v59 = vcvt.s32.f32 %v653_v63  ;;  %vm779_vm12 = vcmp.eq.s32.totalorder %v774_v16, 2 }
 0x3be   :  { %v752_v28 = vsel %vm3580_vm3, 0, %v3579_v25  ;;  %vm776_vm13 = vcmp.eq.s32.totalorder %v774_v16, 0  ;;  %vm775_vm14 = vcmp.lt.s32.totalorder %v774_v16, 2 }
 0x3bf   :  { %v658_v27 = vand.u32 2147483647, %v657_v26  ;;  %v753_v30 = vsub.s32 32, %v752_v28  ;;  %v757_v31 = vsub.s32 4294967266, %v752_v28  ;;  %v754_v54 = vshll.u32 %v745_v5, %v752_v28 }
 0x3c1   :  { %v661_v53 = vmul.f32 %v660_v59, %v658_v27  ;;  %v755_v32 = vshrl.u32 %v737_v29, %v753_v30  ;;  %v758_v33 = vadd.s32 127, %v757_v31 }
 0x3c3   :  { %v662_v34 = vxor.u32 2147483648, %v661_v53  ;;  %v756_v36 = vor.u32 %v755_v32, %v754_v54  ;;  %v759_v39 = vshll.u32 %v758_v33, 23 }
 0x3c5   :  { %v663_v47 = vsel %vm580_vm4, %v662_v34, %v661_v53  ;;  %v760_v40 = vor.u32 4788187, %v759_v39  ;;  %v763_v49 = vcvt.s32.f32 %v756_v36 }
 0x3c6   :  { %v666_v35 = vsel %vm4592_vm5, %v4511_v37, %v663_v47 }
 0x3c7   :  { %4270 = vcosq.f32 %v666_v35  ;;  %v761_v48 = vand.u32 2147483647, %v760_v40 }
 0x3c8   :  { %4272 = vsinq.f32 %v666_v35 }
 0x3c9   :  { %v764_v51 = vmul.f32 %v763_v49, %v761_v48 }
 0x3cb   :  { %v765_v43 = vxor.u32 2147483648, %v764_v51 }
 0x3cd   :  { %v766_v57 = vsel %vm683_vm6, %v765_v43, %v764_v51 }
 0x3ce   :  { %v769_v45 = vsel %vm4604_vm7, %v4513_v38, %v766_v57 }
 0x3cf   :  { %4274 = vcosq.f32 %v769_v45 }
 0x3d0   :  { %4276 = vsinq.f32 %v769_v45 }
 0x3d1   :  { %v4271_v3 = vpop.eup %4270 }
 0x3d2   :  { %v4273_v5 = vpop.eup %4272  ;;  %v677_v7 = vxor.u32 2147483648, %v4271_v3 }
 0x3d3   :  { %v674_v9 = vxor.u32 2147483648, %v4273_v5 }
 0x3d4   :  { %v678_v44 = vsel %vm676_vm8, %v677_v7, %v4273_v5 }
 0x3d5   :  { %v675_v0 = vsel %vm673_vm9, %v4271_v3, %v674_v9 }
 0x3d6   :  { %v679_v13 = vsel %vm672_vm10, %v675_v0, %v678_v44 }
 0x3d7   :  { %v680_v15 = vsel %vm670_vm11, nan, %v679_v13 }
 0x3d8   :  { %3924 = vmatprep.mubr.msk.f32.mxu1 %vm166_vm1, %v680_v15 }
 0x3d9   :  { %v4275_v18 = vpop.eup %4274 }
 0x3da   :  { %v4277_v1 = vpop.eup %4276  ;;  %v780_v63 = vxor.u32 2147483648, %v4275_v18 }
 0x3db   :  { %v777_v58 = vxor.u32 2147483648, %v4277_v1 }
 0x3dc   :  { %v781_v24 = vsel %vm779_vm12, %v780_v63, %v4277_v1 }
 0x3dd   :  { %v778_v25 = vsel %vm776_vm13, %v4275_v18, %v777_v58 }
 0x3de   :  { %v782_v26 = vsel %vm775_vm14, %v778_v25, %v781_v24 }
 0x3df   :  { %v783_v27 = vsel %vm773_vm15, nan, %v782_v26 }
 0x3e0   :  { %3925 = vmatmul.mubr.msk.f32.vlgmr.msra.gmra.mrb[10].mxu1 %vm166_vm1, %v783_v27 }
 0x3e1   :  { %3944 = vmatpush3.msra.mxu1 %v4399_v11  ;;  %3945 = vmatprep.mubr.msk.f32.mxu1 %vm166_vm1, %v4501_v20  ;;  %v3955_v20 = vpop.f32.mrb[18].mxu0 }
 0x3e2   :  { %3959 = vmatprep.subr.mxu1 %v4422_v21  ;;  %v1229_v37 = vpop.f32.mrb[19].mxu0 }
 0x3e3   :  { %v4142_v38 = vpack.c.bf16 %v3955_v20, %v1229_v37  ;;  %v3958_v59 = vpop.f32.mrb[20].mxu0 }
 0x3e4   :  { %3946 = vmatmul.mubr.msk.f32.vlgmr.msra.gmra.mrb[12].mxu1 %vm166_vm1, %v4499_v19  ;;  %v1239_v28 = vpop.f32.mrb[21].mxu0 }
 0x3e5   :  { %3948 = vmatprep.mubr.msk.f32.mxu1 %vm166_vm1, %v4505_v23  ;;  %3960 = vmatpush3.msra.mxu1 %v4422_v21  ;;  %v4146_v19 = vpack.c.bf16 %v3958_v59, %v1239_v28  ;;  %v3610_v23 = vld [vmem:[%s5263_s2 + $0x10] sm:$0xff] }
 0x3e8   :  { %3949 = vmatmul.mubr.msk.f32.gmra.mrb[14].mxu1 %vm166_vm1, %v4503_v22  ;;  %v3613_v22 = vld [vmem:[%s5264_s3 + $0x1] ss:$0 sm:$0xff] }
 0x3e9   :  { %3961 = vmatprep.mubr.msk.f32.mxu1 %vm166_vm1, %v4441_v41  ;;  %v1259_v29 = vmul.f32 %v3613_v22, %v3610_v23  ;;  %v871_v41 = vlaneseq  ;;  %v1260_v45 = vmul.f32 %v3613_v22, %v3611_v62 }
 0x3eb   :  { %v4644_v30 = vand.u32 127, %v871_v41 }
 0x3ec   :  { %3962 = vmatmul.mubr.msk.f32.vlgmr.msra.gmra.mrb[16].mxu1 %vm166_vm1, %v4446_v42  ;;  %v4642_v42 = vld [vmem:[%s5262_s4 + $0x28] ss:$0 sm:$0xff] }
 0x3ed   :  { %3980 = vmatprep.mubr.msk.f32.mxu1 %vm453_vm2, %v1259_v29  ;;  %vm873_vm3 = vcmp.lt.s32.totalorder %v4644_v30, 5 }
 0x4b3   :  { %v3926_v31 = vpop.f32.mrb[10].mxu1 }
 0x4b4   :  { %v866_v53 = vadd.f32 %v3926_v31, %v4642_v42  ;;  %v860_v54 = vpop.f32.mrb[11].mxu1 }
 0x4b5   :  { %v861_v32 = vadd.f32 %v4642_v42, %v860_v54 }
 0x4b6   :  { %v4649_v33 = vmax.f32 %v866_v53, 0.0 }
 0x4b7   :  { %v869_v34 = vmax.f32 %v861_v32, 0.0  ;;  %v3947_v36 = vpop.f32.mrb[12].mxu1 }
 0x4b8   :  { %v1132_v39 = vpop.f32.mrb[13].mxu1  ;;  %v875_v46 = vsel %vm873_vm3, %v4649_v33, inf  ;;  %v877_v47 = vsel %vm873_vm3, %v4649_v33, -inf }
 0x4b9   :  { %v4134_v61 = vpack.c.bf16 %v3947_v36, %v1132_v39  ;;  %v874_v35 = vsel %vm873_vm3, %v869_v34, inf  ;;  %v879_v40 = vsel %vm166_vm1, %v875_v46, inf  ;;  %v876_v48 = vsel %vm873_vm3, %v869_v34, -inf }
 0x4ba   :  { %v878_v49 = vsel %vm166_vm1, %v874_v35, inf  ;;  %v891_v43 = vsel %vm166_vm1, %v876_v48, -inf  ;;  %v892_v56 = vsel %vm166_vm1, %v877_v47, -inf }
 0x4bb   :  { %v3950_v50 = vpop.f32.mrb[14].mxu1  ;;  %4135 = vmatprep.subr.bf16.mxu1 %v4134_v61  ;;  %v880_v51 = vmin.f32 %v878_v49, %v879_v40  ;;  %v893_v60 = vmax.f32 %v891_v43, %v892_v56  ;;  %v4695_v43 = vld [vmem:[%s5260_s0 + $0x28] sm:$0xff] }
 0x4bc   :  { %v1142_v55 = vpop.f32.mrb[15].mxu1  ;;  %4137 = vmatpush3.bf16.msra.mxu1 %v4134_v61 }
 0x4bd   :  { %v4138_v57 = vpack.c.bf16 %v3950_v50, %v1142_v55  ;;  %881 = vmin.xlane.f32.xlu1 %v880_v51  ;;  %v4690_v55 = vld [vmem:[%s5260_s0 + $0x20] sm:$0xff] }
 0x4be   :  { %v4699_v56 = vpack.c.bf16 %v4695_v43, %v4690_v55 }
 0x4bf   :  { %4139 = vmatprep.subr.bf16.mxu1 %v4138_v57 }
 0x4c0   :  { %4141 = vmatpush3.bf16.msra.mxu1 %v4138_v57  ;;  %4151 = vmatprep.subr.bf16.mxu0 %v4699_v56 }
 0x4c1   :  { %4143 = vmatprep.subr.bf16.mxu1 %v4142_v38  ;;  %894 = vmax.xlane.f32.xlu1 %v893_v60 }
 0x4c4   :  { %4145 = vmatpush3.bf16.msra.mxu1 %v4142_v38 }
 0x4c5   :  { %4147 = vmatprep.subr.bf16.mxu1 %v4146_v19 }
 0x4c8   :  { %4149 = vmatpush3.bf16.msra.mxu1 %v4146_v19 }
 0x4c9   :  { %4004 = vmatprep.subr.mxu1 %v4399_v11 }
 0x4cb   :  { %3981 = vmatmul.mubr.msk.f32.vlgmr.msra.gmra.mrb[16].mxu1 %vm453_vm2, %v1260_v45 }
 0x4cc   :  { %4005 = vmatpush3.msra.mxu1 %v4399_v11 }
 0x4cd   :  { %4020 = vmatprep.subr.mxu1 %v4422_v21 }
 0x54a   :  { %v882_v3 = vpop.xlane.xlu1 %881 }
 0x54b   :  { %v883_v5 = vrot.slane %v882_v3, 4 }
 0x54d   :  { %v884_v7 = vmin.f32 %v882_v3, %v883_v5 }
 0x54e   :  { %v895_v8 = vpop.xlane.xlu1 %894 }
 0x54f   :  { %v885_v9 = vrot.slane %v884_v7, 2  ;;  %v896_v44 = vrot.slane %v895_v8, 4 }
 0x551   :  { %v897_v0 = vmax.f32 %v895_v8, %v896_v44  ;;  %v886_v12 = vmin.f32 %v884_v7, %v885_v9 }
 0x553   :  { %v898_v13 = vrot.slane %v897_v0, 2  ;;  %v887_v15 = vrot.slane %v886_v12, 1 }
 0x555   :  { %v888_v16 = vmin.f32 %v886_v12, %v887_v15  ;;  %v899_v18 = vmax.f32 %v897_v0, %v898_v13 }
 0x557   :  { %4210 = vpush %v888_v16  ;;  %v900_v1 = vrot.slane %v899_v18, 1 }
 0x559   :  { %v901_v63 = vmax.f32 %v899_v18, %v900_v1 }
 0x55b   :  { %4212 = vpush %v901_v63 }
 0x588   :  { %s4211_s9 = spop %4210 }
 0x589   :  { %v890_v11 = vstv %s4211_s9 }
 0x58a   :  { %v904_v25 = vsub.f32 %v869_v34, %v890_v11  ;;  %v905_v26 = vsub.f32 %v4649_v33, %v890_v11 }
 0x58c   :  { %s4213_s10 = spop %4212 }
 0x58d   :  { %v903_v21 = vstv %s4213_s10 }
 0x58e   :  { %v906_v58 = vsub.f32 %v903_v21, %v890_v11 }
 0x590   :  { %v907_v24 = vadd.f32 1e-09, %v906_v58 }
 0x592   :  { %4278 = vrcp.f32 %v907_v24 }
 0x59c   :  { %v4279_v27 = vpop.eup %4278 }
 0x59d   :  { %v909_v20 = vmul.f32 %v4279_v27, %v904_v25  ;;  %v910_v37 = vmul.f32 %v4279_v27, %v905_v26 }
 0x59e   :  { %v3982_v38 = vpop.f32.mrb[16].mxu1 }
 0x59f   :  { %911 = vst.msk [vmem:[%s5265_s5] sm:$0xff] %vm166_vm1, %v909_v20  ;;  %912 = vst.msk [vmem:[%s5265_s5 + $0x8] sm:$0xff] %vm166_vm1, %v910_v37  ;;  %v1424_v59 = vadd.f32 %v3982_v38, %v4487_v52  ;;  %v1414_v28 = vpop.f32.mrb[17].mxu1 }
 0x5a0   :  { %v1423_v19 = vadd.f32 %v4487_v52, %v1414_v28 }
 0x5a1   :  { %v1426_v23 = vmax.f32 %v1424_v59, 0.0 }
 0x5a2   :  { %v1425_v22 = vmax.f32 %v1423_v19, 0.0 }
 0x5a3   :  { %v1428_v29 = vsel %vm166_vm1, %v1426_v23, inf  ;;  %v1441_v41 = vsel %vm166_vm1, %v1426_v23, -inf }
 0x5a4   :  { %v1427_v31 = vsel %vm166_vm1, %v1425_v22, inf  ;;  %v1440_v53 = vsel %vm166_vm1, %v1425_v22, -inf }
 0x5a5   :  { %v1429_v54 = vmin.f32 %v1427_v31, %v1428_v29  ;;  %v1442_v32 = vmax.f32 %v1440_v53, %v1441_v41 }
 0x5a7   :  { %1430 = vmin.xlane.f32.xlu0 %v1429_v54  ;;  %1443 = vmax.xlane.f32.xlu1 %v1442_v32 }
 0x634   :  { %v1431_v33 = vpop.xlane.xlu0 %1430  ;;  %v1444_v34 = vpop.xlane.xlu1 %1443 }
 0x635   :  { %v1432_v36 = vrot.slane %v1431_v33, 4  ;;  %v1445_v39 = vrot.slane %v1444_v34, 4 }
 0x637   :  { %v1433_v46 = vmin.f32 %v1431_v33, %v1432_v36  ;;  %v1446_v52 = vmax.f32 %v1444_v34, %v1445_v39 }
 0x639   :  { %v1434_v47 = vrot.slane %v1433_v46, 2  ;;  %v1447_v61 = vrot.slane %v1446_v52, 2 }
 0x63b   :  { %v1435_v35 = vmin.f32 %v1433_v46, %v1434_v47  ;;  %v1448_v40 = vmax.f32 %v1446_v52, %v1447_v61 }
 0x63d   :  { %v1436_v48 = vrot.slane %v1435_v35, 1  ;;  %v1449_v49 = vrot.slane %v1448_v40, 1 }
 0x63f   :  { %v1437_v50 = vmin.f32 %v1435_v35, %v1436_v48  ;;  %v1450_v51 = vmax.f32 %v1448_v40, %v1449_v49 }
 0x641   :  { %4214 = vpush %v1437_v50 }
 0x642   :  { %4216 = vpush %v1450_v51 }
 0x672   :  { %s4215_s19 = spop %4214 }
 0x673   :  { %v1439_v57 = vstv %s4215_s19  ;;  %s4217_s20 = spop %4216 }
 0x674   :  { %v1452_v60 = vstv %s4217_s20  ;;  %v1453_v3 = vsub.f32 %v1425_v22, %v1439_v57  ;;  %v1454_v5 = vsub.f32 %v1426_v23, %v1439_v57 }
 0x675   :  { %v1455_v62 = vsub.f32 %v1452_v60, %v1439_v57 }
 0x677   :  { %v1456_v45 = vadd.f32 1e-09, %v1455_v62 }
 0x679   :  { %4280 = vrcp.f32 %v1456_v45 }
 0x683   :  { %v4281_v7 = vpop.eup %4280 }
 0x684   :  { %v1458_v8 = vmul.f32 %v4281_v7, %v1453_v3  ;;  %v1459_v9 = vmul.f32 %v4281_v7, %v1454_v5 }
 0x686   :  { %v4702_v44 = vmul.f32 3.1415927, %v1458_v8  ;;  %v4704_v0 = vmul.f32 3.1415927, %v1459_v9 }
 0x688   :  { %v1465_v12 = vand.u32 2139095040, %v4702_v44  ;;  %v1568_v13 = vand.u32 2139095040, %v4704_v0  ;;  %v1462_v15 = vand.u32 2147483647, %v4702_v44  ;;  %v1565_v16 = vand.u32 2147483647, %v4704_v0 }
 0x68a   :  { %v1466_v18 = vshrl.u32 %v1465_v12, 23  ;;  %v1569_v1 = vshrl.u32 %v1568_v13, 23  ;;  %v1469_v21 = vand.u32 8388607, %v1462_v15  ;;  %v1572_v58 = vand.u32 8388607, %v1565_v16 }
 0x68c   :  { %v3618_v63 = vadd.s32 4294967169, %v1466_v18  ;;  %v3622_v11 = vadd.s32 4294967169, %v1569_v1  ;;  %v1470_v26 = vor.u32 8388608, %v1469_v21  ;;  %v1573_v27 = vor.u32 8388608, %v1572_v58 }
 0x68e   :  { %v1472_v24 = vadd.s32 1, %v3618_v63  ;;  %v1575_v25 = vadd.s32 1, %v3622_v11  ;;  %v4716_v22 = vshll.u32 %v1470_v26, 8  ;;  %v4718_v29 = vshll.u32 %v1573_v27, 8 }
 0x690   :  { %vm1473_vm4 = vcmp.gt.s32.totalorder %v1472_v24, 0  ;;  %vm1576_vm5 = vcmp.gt.s32.totalorder %v1575_v25, 0 }
 0x691   :  { %v1474_v20 = vsel %vm1473_vm4, %v1472_v24, 0  ;;  %v1577_v37 = vsel %vm1576_vm5, %v1575_v25, 0 }
 0x692   :  { %v1476_v38 = vand.u32 31, %v1474_v20  ;;  %v1579_v59 = vand.u32 31, %v1577_v37  ;;  %v1475_v28 = vshrl.u32 %v1474_v20, 5  ;;  %v4714_v19 = vshrl.u32 %v1577_v37, 5 }
 0x694   :  { %v1477_v23 = vsub.s32 32, %v1476_v38  ;;  %v1580_v41 = vsub.s32 32, %v1579_v59  ;;  %v1479_v31 = vshll.u32 %v4322_v2, %v1476_v38  ;;  %v1482_v53 = vshll.u32 %v4323_v4, %v1476_v38 }
 0x695   :  { %v1485_v54 = vshll.u32 %v4324_v6, %v1476_v38  ;;  %v1488_v36 = vshll.u32 %v4325_v10, %v1476_v38  ;;  %v1491_v46 = vshll.u32 %v4326_v14, %v1476_v38  ;;  %vm1494_vm6 = vcmp.lt.s32.totalorder %v1475_v28, 1 }
 0x696   :  { %v1480_v32 = vshrl.u32 %v4323_v4, %v1477_v23  ;;  %v1483_v33 = vshrl.u32 %v4324_v6, %v1477_v23  ;;  %v1486_v34 = vshrl.u32 %v4325_v10, %v1477_v23  ;;  %v1489_v39 = vshrl.u32 %v4326_v14, %v1477_v23 }
 0x697   :  { %v1492_v52 = vshrl.u32 %v4327_v17, %v1477_v23  ;;  %v1478_v47 = vshrl.u32 %v4322_v2, %v1477_v23  ;;  %vm1496_vm7 = vcmp.lt.s32.totalorder %v1475_v28, 3  ;;  %vm1497_vm8 = vcmp.lt.s32.totalorder %v1475_v28, 4 }
 0x698   :  { %v1481_v61 = vor.u32 %v1480_v32, %v1479_v31  ;;  %v1484_v35 = vor.u32 %v1483_v33, %v1482_v53  ;;  %v1487_v40 = vor.u32 %v1486_v34, %v1485_v54  ;;  %v1490_v48 = vor.u32 %v1489_v39, %v1488_v36 }
 0x699   :  { %v1493_v49 = vor.u32 %v1492_v52, %v1491_v46  ;;  %v1583_v5 = vshrl.u32 %v4323_v4, %v1580_v41  ;;  %vm1495_vm9 = vcmp.lt.s32.totalorder %v1475_v28, 2  ;;  %v1582_v9 = vshll.u32 %v4322_v2, %v1579_v59 }
 0x69a   :  { %v1498_v50 = vsel %vm1494_vm6, %v1478_v47, %v1481_v61  ;;  %v1499_v51 = vsel %vm1497_vm8, %v1487_v40, 2102212464  ;;  %v1502_v57 = vsel %vm1494_vm6, %v1481_v61, %v1484_v35  ;;  %v1506_v60 = vsel %vm1494_vm6, %v1484_v35, %v1487_v40 }
 0x69b   :  { %v1500_v62 = vsel %vm1496_vm7, %v1484_v35, %v1499_v51  ;;  %v1503_v45 = vsel %vm1497_vm8, %v1490_v48, 920167782  ;;  %v1507_v3 = vsel %vm1497_vm8, %v1493_v49, 1326507024  ;;  %v1585_v1 = vshll.u32 %v4323_v4, %v1579_v59 }
 0x69c   :  { %v1504_v7 = vsel %vm1496_vm7, %v1487_v40, %v1503_v45  ;;  %v1508_v8 = vsel %vm1496_vm7, %v1490_v48, %v1507_v3  ;;  %v1501_v12 = vsel %vm1495_vm9, %v1498_v50, %v1500_v62  ;;  %v1584_v24 = vor.u32 %v1583_v5, %v1582_v9 }
 0x69d   :  { %v1505_v13 = vsel %vm1495_vm9, %v1502_v57, %v1504_v7  ;;  %v1509_v18 = vsel %vm1495_vm9, %v1506_v60, %v1508_v8  ;;  %v1586_v25 = vshrl.u32 %v4324_v6, %v1580_v41  ;;  %v1588_v26 = vshll.u32 %v4324_v6, %v1579_v59 }
 0x69e   :  { %v4735_v63 = vmul.u32.u64.low %v4716_v22, %v1509_v18  ;;  %v4736_v11 = vmul.u32.u64.high %v4716_v22, %v1509_v18, %v4735_v63  ;;  %v4739_v21 = vmul.u32.u64.low %v4716_v22, %v1505_v13  ;;  %v4740_v58 = vmul.u32.u64.high %v4716_v22, %v1505_v13, %v4739_v21 }
 0x69f   :  { %v1589_v27 = vshrl.u32 %v4325_v10, %v1580_v41  ;;  %v1581_v20 = vshrl.u32 %v4322_v2, %v1580_v41  ;;  %v1591_v37 = vshll.u32 %v4325_v10, %v1579_v59  ;;  %v1592_v38 = vshrl.u32 %v4326_v14, %v1580_v41 }
 0x6a0   :  { %v1595_v28 = vshrl.u32 %v4327_v17, %v1580_v41  ;;  %v1517_v23 = vmul.u32 %v4716_v22, %v1501_v12  ;;  %v1587_v31 = vor.u32 %v1586_v25, %v1585_v1  ;;  %v1594_v54 = vshll.u32 %v4326_v14, %v1579_v59 }
 0x6a1   :  { %v1590_v53 = vor.u32 %v1589_v27, %v1588_v26  ;;  %vm1519_vm10 = vc.u32 %v4736_v11, %v4739_v21  ;;  %v1520_v32 = vadd.s32 1, %v4740_v58  ;;  %v1593_v33 = vor.u32 %v1592_v38, %v1591_v37 }
 0x6a2   :  { %vm1597_vm11 = vcmp.lt.s32.totalorder %v4714_v19, 1  ;;  %v1596_v34 = vor.u32 %v1595_v28, %v1594_v54  ;;  %vm1599_vm12 = vcmp.lt.s32.totalorder %v4714_v19, 3  ;;  %vm1600_vm13 = vcmp.lt.s32.totalorder %v4714_v19, 4 }
 0x6a3   :  { %v1605_v36 = vsel %vm1597_vm11, %v1584_v24, %v1587_v31  ;;  %v1521_v41 = vsel %vm1519_vm10, %v1520_v32, %v4740_v58  ;;  %v1602_v22 = vsel %vm1600_vm13, %v1590_v53, 2102212464  ;;  %v1606_v39 = vsel %vm1600_vm13, %v1593_v33, 920167782 }
 0x6a4   :  { %v1609_v46 = vsel %vm1597_vm11, %v1587_v31, %v1590_v53  ;;  %v1522_v52 = vadd.s32 %v1521_v41, %v1517_v23  ;;  %vm1598_vm14 = vcmp.lt.s32.totalorder %v4714_v19, 2  ;;  %v1607_v59 = vsel %vm1599_vm12, %v1590_v53, %v1606_v39 }
 0x6a5   :  { %v1610_v47 = vsel %vm1600_vm13, %v1596_v34, 1326507024  ;;  %v1601_v61 = vsel %vm1597_vm11, %v1581_v20, %v1584_v24  ;;  %v1603_v35 = vsel %vm1599_vm12, %v1587_v31, %v1602_v22  ;;  %v1608_v40 = vsel %vm1598_vm14, %v1605_v36, %v1607_v59 }
 0x6a6   :  { %v1611_v48 = vsel %vm1599_vm12, %v1593_v33, %v1610_v47  ;;  %v1523_v49 = vadd.s32 536870912, %v1522_v52  ;;  %v4759_v51 = vmul.u32.u64.low %v4718_v29, %v1608_v40  ;;  %v4760_v57 = vmul.u32.u64.high %v4718_v29, %v1608_v40, %v4759_v51 }
 0x6a7   :  { %v1612_v50 = vsel %vm1598_vm14, %v1609_v46, %v1611_v48  ;;  %v1604_v3 = vsel %vm1598_vm14, %v1601_v61, %v1603_v35  ;;  %v1518_v37 = vadd.s32 %v4739_v21, %v4736_v11  ;;  %vm1464_vm6 = vcmp.lt.s32.totalorder %v4702_v44, 0 }
 0x6a8   :  { %v4763_v60 = vmul.u32.u64.low %v4718_v29, %v1612_v50  ;;  %v4764_v62 = vmul.u32.u64.high %v4718_v29, %v1612_v50, %v4763_v60  ;;  %v1524_v45 = vshrl.u32 %v1523_v49, 30  ;;  %v1623_v19 = vadd.s32 1, %v4760_v57 }
 0x6a9   :  { %v1620_v7 = vmul.u32 %v4718_v29, %v1604_v3  ;;  %vm4775_vm7 = vcmp.le.f32.partialorder %v1462_v15, 0.7853982  ;;  %vm1567_vm8 = vcmp.lt.s32.totalorder %v4704_v0, 0  ;;  %vm4787_vm9 = vcmp.le.f32.partialorder %v1565_v16, 0.7853982 }
 0x6aa   :  { %v1525_v5 = vshll.u32 %v1524_v45, 30  ;;  %vm1622_vm15 = vc.u32 %v4764_v62, %v4759_v51  ;;  %v1621_v46 = vadd.s32 %v4759_v51, %v4764_v62  ;;  %vm1554_vm13 = vweird.f32 %v4702_v44 }
 0x6ab   :  { %v1624_v9 = vsel %vm1622_vm15, %v1623_v19, %v4760_v57  ;;  %v1548_v57 = vsub.s32 4, %v1524_v45 }
 0x6ac   :  { %v1526_v8 = vsub.s32 %v1522_v52, %v1525_v5  ;;  %v1625_v12 = vadd.s32 %v1624_v9, %v1620_v7 }
 0x6ad   :  { %v1549_v5 = vsel %vm1464_vm6, %v1548_v57, %v1524_v45 }
 0x6ae   :  { %v1528_v13 = vsub.s32 0, %v1526_v8  ;;  %v1626_v18 = vadd.s32 536870912, %v1625_v12  ;;  %v1551_v7 = vsel %vm4775_vm7, 0, %v1549_v5 }
 0x6b0   :  { %v3619_v1 = vmin.u32 %v1528_v13, %v1526_v8  ;;  %v1627_v63 = vshrl.u32 %v1626_v18, 30  ;;  %v1555_v13 = vand.u32 3, %v1551_v7  ;;  %v4873_v7 = vld [vmem:[%s5262_s4 + $0x10] sm:$0xff] }
 0x6b2   :  { %v1530_v58 = vclz %v3619_v1  ;;  %v1628_v24 = vshll.u32 %v1627_v63, 30  ;;  %vm1560_vm10 = vcmp.eq.s32.totalorder %v1555_v13, 2  ;;  %vm1557_vm11 = vcmp.eq.s32.totalorder %v1555_v13, 0 }
 0x6b3   :  { %vm1556_vm12 = vcmp.lt.s32.totalorder %v1555_v13, 2 }
 0x6b4   :  { %v3620_v25 = vadd.s32 4294967294, %v1530_v58  ;;  %v1629_v26 = vsub.s32 %v1625_v12, %v1628_v24  ;;  %v1651_v12 = vsub.s32 4, %v1627_v63 }
 0x6b6   :  { %vm3621_vm4 = vcmp.lt.s32.totalorder %v3620_v25, 0  ;;  %v1631_v20 = vsub.s32 0, %v1629_v26  ;;  %v1652_v24 = vsel %vm1567_vm8, %v1651_v12, %v1627_v63 }
 0x6b7   :  { %v1533_v27 = vsel %vm3621_vm4, 0, %v3620_v25 }
 0x6b8   :  { %v1534_v29 = vsub.s32 32, %v1533_v27  ;;  %v1538_v38 = vsub.s32 4294967266, %v1533_v27  ;;  %v3623_v28 = vmin.u32 %v1631_v20, %v1629_v26  ;;  %v1535_v23 = vshll.u32 %v1526_v8, %v1533_v27 }
 0x6b9   :  { %v1654_v27 = vsel %vm4787_vm9, 0, %v1652_v24 }
 0x6ba   :  { %v1536_v31 = vshrl.u32 %v1518_v37, %v1534_v29  ;;  %v1539_v53 = vadd.s32 127, %v1538_v38  ;;  %v1633_v54 = vclz %v3623_v28  ;;  %v1658_v29 = vand.u32 3, %v1654_v27 }
 0x6bc   :  { %v1537_v32 = vor.u32 %v1536_v31, %v1535_v23  ;;  %v1540_v33 = vshll.u32 %v1539_v53, 23  ;;  %v3624_v34 = vadd.s32 4294967294, %v1633_v54  ;;  %vm1663_vm14 = vcmp.eq.s32.totalorder %v1658_v29, 2 }
 0x6bd   :  { %vm1660_vm15 = vcmp.eq.s32.totalorder %v1658_v29, 0  ;;  %vm1659_vm4 = vcmp.lt.s32.totalorder %v1658_v29, 2 }
 0x6be   :  { %v1541_v36 = vor.u32 4788187, %v1540_v33  ;;  %vm3625_vm5 = vcmp.lt.s32.totalorder %v3624_v34, 0  ;;  %v1544_v22 = vcvt.s32.f32 %v1537_v32  ;;  %v3633_v33 = vld [vmem:[%s5261_s1 + $0x88] sm:$0xff] }
 0x6bf   :  { %v1636_v39 = vsel %vm3625_vm5, 0, %v3624_v34  ;;  %vm1657_vm5 = vweird.f32 %v4704_v0  ;;  %v4814_v34 = vld [vmem:[%s5262_s4 + $0x8] sm:$0xff] }
 0x6c0   :  { %v1542_v41 = vand.u32 2147483647, %v1541_v36  ;;  %v1637_v52 = vsub.s32 32, %v1636_v39  ;;  %v1641_v59 = vsub.s32 4294967266, %v1636_v39  ;;  %v1638_v21 = vshll.u32 %v1629_v26, %v1636_v39  ;;  %v3636_v36 = vld [vmem:[%s5261_s1 + $0xa0] sm:$0xff]  ;;  %v3638_v39 = vld [vmem:[%s5261_s1 + $0xb0] sm:$0xff] }
 0x6c2   :  { %v1545_v11 = vmul.f32 %v1544_v22, %v1542_v41  ;;  %v1639_v47 = vshrl.u32 %v1621_v46, %v1637_v52  ;;  %v1642_v61 = vadd.s32 127, %v1641_v59  ;;  %v4829_v41 = vld [vmem:[%s5262_s4 + $0x20] sm:$0xff]  ;;  %v3637_v22 = vld [vmem:[%s5261_s1 + $0xa8] sm:$0xff]  ;;  %v3639_v46 = vld [vmem:[%s5261_s1 + $0xb8] sm:$0xff] }
 0x6c4   :  { %v1546_v35 = vxor.u32 2147483648, %v1545_v11  ;;  %v1640_v40 = vor.u32 %v1639_v47, %v1638_v21  ;;  %v1643_v48 = vshll.u32 %v1642_v61, 23 }
 0x6c6   :  { %v1547_v50 = vsel %vm1464_vm6, %v1546_v35, %v1545_v11  ;;  %v1644_v60 = vor.u32 4788187, %v1643_v48  ;;  %v1647_v3 = vcvt.s32.f32 %v1640_v40 }
 0x6c7   :  { %v1550_v51 = vsel %vm4775_vm7, %v4702_v44, %v1547_v50  ;;  %v3632_v44 = vld [vmem:[%s5261_s1 + $0x80] sm:$0xff] }
 0x6c8   :  { %4282 = vcosq.f32 %v1550_v51  ;;  %v1645_v62 = vand.u32 2147483647, %v1644_v60 }
 0x6c9   :  { %4284 = vsinq.f32 %v1550_v51 }
 0x6ca   :  { %v1648_v19 = vmul.f32 %v1647_v3, %v1645_v62 }
 0x6cc   :  { %v1649_v15 = vxor.u32 2147483648, %v1648_v19 }
 0x6ce   :  { %v1650_v9 = vsel %vm1567_vm8, %v1649_v15, %v1648_v19 }
 0x6cf   :  { %v1653_v45 = vsel %vm4787_vm9, %v4704_v0, %v1650_v9  ;;  %v3634_v0 = vld [vmem:[%s5261_s1 + $0x90] sm:$0xff] }
 0x6d0   :  { %4286 = vcosq.f32 %v1653_v45 }
 0x6d1   :  { %4288 = vsinq.f32 %v1653_v45  ;;  %v3659_v45 = vld [vmem:[%s5264_s3 + $0x2] ss:$0 sm:$0xff] }
 0x6d2   :  { %v4283_v18 = vpop.eup %4282 }
 0x6d3   :  { %v4285_v1 = vpop.eup %4284  ;;  %v1561_v58 = vxor.u32 2147483648, %v4283_v18 }
 0x6d4   :  { %v1558_v25 = vxor.u32 2147483648, %v4285_v1 }
 0x6d5   :  { %v1562_v16 = vsel %vm1560_vm10, %v1561_v58, %v4285_v1 }
 0x6d6   :  { %v1559_v26 = vsel %vm1557_vm11, %v4283_v18, %v1558_v25 }
 0x6d7   :  { %v1563_v20 = vsel %vm1556_vm12, %v1559_v26, %v1562_v16 }
 0x6d8   :  { %v1564_v37 = vsel %vm1554_vm13, nan, %v1563_v20 }
 0x6d9   :  { %3985 = vmatprep.mubr.msk.f32.mxu0 %vm166_vm1, %v1564_v37 }
 0x6da   :  { %v4287_v38 = vpop.eup %4286 }
 0x6db   :  { %v4289_v28 = vpop.eup %4288  ;;  %v1664_v23 = vxor.u32 2147483648, %v4287_v38 }
 0x6dc   :  { %v1661_v63 = vxor.u32 2147483648, %v4289_v28 }
 0x6dd   :  { %v1665_v31 = vsel %vm1663_vm14, %v1664_v23, %v4289_v28 }
 0x6de   :  { %v1662_v53 = vsel %vm1660_vm15, %v4287_v38, %v1661_v63 }
 0x6df   :  { %v1666_v54 = vsel %vm1659_vm4, %v1662_v53, %v1665_v31 }
 0x6e0   :  { %v1667_v32 = vsel %vm1657_vm5, nan, %v1666_v54 }
 0x6e1   :  { %3986 = vmatmul.mubr.msk.f32.vlgmr.msra.gmra.mrb[22].mxu0 %vm166_vm1, %v1667_v32 }
 0x6e2   :  { %4153 = vmatpush3.bf16.msra.mxu0 %v4699_v56  ;;  %3992 = vmatprep.mubr.msk.f32.mxu0 %vm36_vm0, %v3632_v44  ;;  %v3635_v56 = vld [vmem:[%s5261_s1 + $0x98] sm:$0xff] }
 0x6e3   :  { %4012 = vmatprep.subr.mxu0 %v4814_v34 }
 0x6e5   :  { %3993 = vmatmul.mubr.msk.f32.vlgmr.msra.gmra.mrb[24].mxu0 %vm36_vm0, %v3633_v33 }
 0x6e6   :  { %3995 = vmatprep.mubr.msk.f32.mxu0 %vm36_vm0, %v3634_v0  ;;  %4013 = vmatpush3.msra.mxu0 %v4814_v34 }
 0x6e7   :  { %4044 = vmatprep.subr.mxu0 %v4829_v41 }
 0x6e9   :  { %3996 = vmatmul.mubr.msk.f32.gmra.mrb[26].mxu0 %vm36_vm0, %v3635_v56 }
 0x6ea   :  { %3998 = vmatprep.mubr.msk.f32.mxu0 %vm36_vm0, %v3636_v36 }
 0x6ed   :  { %3999 = vmatmul.mubr.msk.f32.gmra.mrb[28].mxu0 %vm36_vm0, %v3637_v22 }
 0x6ee   :  { %4001 = vmatprep.mubr.msk.f32.mxu0 %vm36_vm0, %v3638_v39 }
 0x6f1   :  { %4002 = vmatmul.mubr.msk.f32.gmra.mrb[30].mxu0 %vm36_vm0, %v3639_v46 }
 0x7b4   :  { %v3987_v52 = vpop.f32.mrb[22].mxu0 }
 0x7b5   :  { %v1746_v59 = vadd.f32 %v3987_v52, %v4642_v42  ;;  %v1740_v11 = vpop.f32.mrb[23].mxu0 }
 0x7b6   :  { %v1741_v21 = vadd.f32 %v4642_v42, %v1740_v11 }
 0x7b7   :  { %v4848_v47 = vmax.f32 %v1746_v59, 0.0 }
 0x7b8   :  { %v4850_v61 = vmax.f32 %v1741_v21, 0.0  ;;  %v3994_v35 = vpop.f32.mrb[24].mxu0 }
 0x7b9   :  { %v1893_v40 = vpop.f32.mrb[25].mxu0  ;;  %v1754_v48 = vsel %vm873_vm3, %v4848_v47, -inf  ;;  %v1752_v49 = vsel %vm873_vm3, %v4848_v47, inf }
 0x7ba   :  { %4006 = vmatprep.mubr.msk.f32.mxu1 %vm166_vm1, %v1893_v40  ;;  %v1753_v42 = vsel %vm873_vm3, %v4850_v61, -inf  ;;  %v1769_v50 = vsel %vm166_vm1, %v1754_v48, -inf  ;;  %v1751_v57 = vsel %vm873_vm3, %v4850_v61, inf  ;;  %v1756_v51 = vsel %vm166_vm1, %v1752_v49, inf  ;;  %v3657_v40 = vld [vmem:[%s5263_s2 + $0x28] sm:$0xff] }
 0x7bb   :  { %4007 = vmatmul.mubr.msk.f32.vlgmr.msra.gmra.mrb[18].mxu1 %vm166_vm1, %v3994_v35  ;;  %v1768_v60 = vsel %vm166_vm1, %v1753_v42, -inf  ;;  %v1755_v62 = vsel %vm166_vm1, %v1751_v57, inf  ;;  %v4915_v57 = vld [vmem:[%s5262_s4 + $0x18] ss:$0 sm:$0xff] }
 0x7bc   :  { %v3997_v3 = vpop.f32.mrb[26].mxu0  ;;  %v1770_v5 = vmax.f32 %v1768_v60, %v1769_v50  ;;  %v1757_v19 = vmin.f32 %v1755_v62, %v1756_v51  ;;  %4021 = vmatpush3.msra.mxu1 %v4873_v7 }
 0x7bd   :  { %v1903_v15 = vpop.f32.mrb[27].mxu0 }
 0x7be   :  { %4009 = vmatprep.mubr.msk.f32.mxu1 %vm166_vm1, %v1903_v15  ;;  %1771 = vmax.xlane.f32.xlu1 %v1770_v5 }
 0x7bf   :  { %1758 = vmin.xlane.f32.xlu0 %v1757_v19  ;;  %4010 = vmatmul.mubr.msk.f32.gmra.mrb[20].mxu1 %vm166_vm1, %v3997_v3 }
 0x7c0   :  { %v4000_v8 = vpop.f32.mrb[28].mxu0  ;;  %4022 = vmatprep.mubr.msk.f32.mxu1 %vm166_vm1, %v4690_v55  ;;  %v3656_v55 = vld [vmem:[%s5263_s2 + $0x20] sm:$0xff] }
 0x7c1   :  { %v1913_v9 = vpop.f32.mrb[29].mxu0  ;;  %v2137_v18 = vmul.f32 %v3659_v45, %v3656_v55 }
 0x7c2   :  { %4014 = vmatprep.mubr.msk.f32.mxu0 %vm166_vm1, %v1913_v9 }
 0x7c3   :  { %4015 = vmatmul.mubr.msk.f32.vlgmr.msra.gmra.mrb[32].mxu0 %vm166_vm1, %v4000_v8  ;;  %4023 = vmatmul.mubr.msk.f32.vlgmr.msra.gmra.mrb[22].mxu1 %vm166_vm1, %v4695_v43 }
 0x7c4   :  { %v4003_v12 = vpop.f32.mrb[30].mxu0  ;;  %4045 = vmatpush3.msra.mxu0 %v4829_v41  ;;  %4041 = vmatprep.mubr.msk.f32.mxu1 %vm453_vm2, %v2137_v18 }
 0x7c5   :  { %v1923_v13 = vpop.f32.mrb[31].mxu0 }
 0x7c6   :  { %4017 = vmatprep.mubr.msk.f32.mxu0 %vm166_vm1, %v1923_v13 }
 0x7c7   :  { %4018 = vmatmul.mubr.msk.f32.gmra.mrb[34].mxu0 %vm166_vm1, %v4003_v12 }
 0x84b   :  { %v1772_v43 = vpop.xlane.xlu1 %1771 }
 0x84c   :  { %v1773_v1 = vrot.slane %v1772_v43, 4  ;;  %v1759_v58 = vpop.xlane.xlu0 %1758 }
 0x84d   :  { %v1760_v24 = vrot.slane %v1759_v58, 4 }
 0x84e   :  { %v1774_v25 = vmax.f32 %v1772_v43, %v1773_v1 }
 0x84f   :  { %v1761_v16 = vmin.f32 %v1759_v58, %v1760_v24 }
 0x850   :  { %v1775_v26 = vrot.slane %v1774_v25, 2 }
 0x851   :  { %v1762_v27 = vrot.slane %v1761_v16, 2 }
 0x852   :  { %v1776_v20 = vmax.f32 %v1774_v25, %v1775_v26 }
 0x853   :  { %v1763_v37 = vmin.f32 %v1761_v16, %v1762_v27 }
 0x854   :  { %v1777_v29 = vrot.slane %v1776_v20, 1 }
 0x855   :  { %v1764_v38 = vrot.slane %v1763_v37, 1 }
 0x856   :  { %v1778_v28 = vmax.f32 %v1776_v20, %v1777_v29 }
 0x857   :  { %v1765_v23 = vmin.f32 %v1763_v37, %v1764_v38  ;;  %v4926_v38 = vld [vmem:[%s5260_s0 + $0x30] sm:$0xff] }
 0x859   :  { %4226 = vpush %v1765_v23 }
 0x85a   :  { %4228 = vpush %v1778_v28  ;;  %v4931_v28 = vld [vmem:[%s5260_s0 + $0x38] sm:$0xff] }
 0x85b   :  { %v4935_v23 = vpack.c.bf16 %v4931_v28, %v4926_v38 }
 0x85d   :  { %4171 = vmatprep.subr.bf16.mxu0 %v4935_v23 }
 0x88a   :  { %s4227_s22 = spop %4226 }
 0x88b   :  { %v1767_v63 = vstv %s4227_s22  ;;  %s4229_s23 = spop %4228 }
 0x88c   :  { %v1780_v31 = vstv %s4229_s23  ;;  %v1781_v52 = vsub.f32 %v4850_v61, %v1767_v63  ;;  %v1782_v59 = vsub.f32 %v4848_v47, %v1767_v63  ;;  %v2138_v47 = vmul.f32 %v3659_v45, %v3657_v40  ;;  %v4319_v61 = vld [vmem:[%s5262_s4] sm:$0xff] }
 0x88d   :  { %v1783_v53 = vsub.f32 %v1780_v31, %v1767_v63 }
 0x88e   :  { %v4008_v54 = vpop.f32.mrb[18].mxu1 }
 0x88f   :  { %v1784_v44 = vadd.f32 1e-09, %v1783_v53  ;;  %v2010_v32 = vpop.f32.mrb[19].mxu1 }
 0x890   :  { %v4154_v33 = vpack.c.bf16 %v4008_v54, %v2010_v32 }
 0x891   :  { %4290 = vrcp.f32 %v1784_v44 }
 0x892   :  { %v4011_v0 = vpop.f32.mrb[20].mxu1  ;;  %4155 = vmatprep.subr.bf16.mxu1 %v4154_v33 }
 0x893   :  { %v2020_v56 = vpop.f32.mrb[21].mxu1  ;;  %4157 = vmatpush3.bf16.msra.mxu1 %v4154_v33 }
 0x894   :  { %v4158_v36 = vpack.c.bf16 %v4011_v0, %v2020_v56 }
 0x896   :  { %v4016_v22 = vpop.f32.mrb[32].mxu0  ;;  %4159 = vmatprep.subr.bf16.mxu1 %v4158_v36 }
 0x897   :  { %v2107_v39 = vpop.f32.mrb[33].mxu0  ;;  %4161 = vmatpush3.bf16.msra.mxu1 %v4158_v36 }
 0x898   :  { %v4162_v46 = vpack.c.bf16 %v4016_v22, %v2107_v39 }
 0x89a   :  { %v4019_v11 = vpop.f32.mrb[34].mxu0  ;;  %4163 = vmatprep.subr.bf16.mxu1 %v4162_v46 }
 0x89b   :  { %v4291_v21 = vpop.eup %4290  ;;  %v2117_v35 = vpop.f32.mrb[35].mxu0  ;;  %4165 = vmatpush3.bf16.msra.mxu1 %v4162_v46 }
 0x89c   :  { %v1786_v48 = vmul.f32 %v4291_v21, %v1781_v52  ;;  %v1787_v49 = vmul.f32 %v4291_v21, %v1782_v59  ;;  %v4166_v42 = vpack.c.bf16 %v4019_v11, %v2117_v35 }
 0x89e   :  { %3628 = vst.msk [vmem:[%s5265_s5 + $0x10] sm:$0xff] %vm166_vm1, %v1786_v48  ;;  %3629 = vst.msk [vmem:[%s5265_s5 + $0x18] sm:$0xff] %vm166_vm1, %v1787_v49  ;;  %4167 = vmatprep.subr.bf16.mxu1 %v4166_v42 }
 0x89f   :  { %4169 = vmatpush3.bf16.msra.mxu1 %v4166_v42 }
 0x8a0   :  { %4065 = vmatprep.subr.mxu1 %v4319_v61 }
 0x8a2   :  { %4042 = vmatmul.mubr.msk.f32.vlgmr.msra.gmra.mrb[22].mxu1 %vm453_vm2, %v2138_v47 }
 0x8a3   :  { %4066 = vmatpush3.msra.mxu1 %v4319_v61 }
 0x8a4   :  { %4081 = vmatprep.subr.mxu1 %v4873_v7 }
 0x975   :  { %v4043_v50 = vpop.f32.mrb[22].mxu1 }
 0x976   :  { %v2302_v51 = vadd.f32 %v4915_v57, %v4043_v50  ;;  %v2292_v60 = vpop.f32.mrb[23].mxu1 }
 0x977   :  { %v2301_v62 = vadd.f32 %v4915_v57, %v2292_v60 }
 0x978   :  { %v2304_v3 = vmax.f32 %v2302_v51, 0.0 }
 0x979   :  { %v2303_v5 = vmax.f32 %v2301_v62, 0.0 }
 0x97a   :  { %v2319_v19 = vsel %vm166_vm1, %v2304_v3, -inf  ;;  %v2306_v15 = vsel %vm166_vm1, %v2304_v3, inf }
 0x97b   :  { %v2318_v8 = vsel %vm166_vm1, %v2303_v5, -inf  ;;  %v2305_v9 = vsel %vm166_vm1, %v2303_v5, inf }
 0x97c   :  { %v2320_v12 = vmax.f32 %v2318_v8, %v2319_v19  ;;  %v2307_v13 = vmin.f32 %v2305_v9, %v2306_v15 }
 0x97e   :  { %2321 = vmax.xlane.f32.xlu1 %v2320_v12  ;;  %2308 = vmin.xlane.f32.xlu0 %v2307_v13 }
 0xa0b   :  { %v2322_v55 = vpop.xlane.xlu1 %2321  ;;  %v2309_v45 = vpop.xlane.xlu0 %2308 }
 0xa0c   :  { %v2323_v18 = vrot.slane %v2322_v55, 4  ;;  %v2310_v43 = vrot.slane %v2309_v45, 4 }
 0xa0e   :  { %v2324_v1 = vmax.f32 %v2322_v55, %v2323_v18  ;;  %v2311_v58 = vmin.f32 %v2309_v45, %v2310_v43 }
 0xa10   :  { %v2325_v24 = vrot.slane %v2324_v1, 2  ;;  %v2312_v25 = vrot.slane %v2311_v58, 2 }
 0xa12   :  { %v2313_v16 = vmin.f32 %v2311_v58, %v2312_v25  ;;  %v2326_v26 = vmax.f32 %v2324_v1, %v2325_v24 }
 0xa14   :  { %v2314_v27 = vrot.slane %v2313_v16, 1  ;;  %v2327_v20 = vrot.slane %v2326_v26, 1 }
 0xa16   :  { %v2315_v37 = vmin.f32 %v2313_v16, %v2314_v27  ;;  %v2328_v29 = vmax.f32 %v2326_v26, %v2327_v20 }
 0xa18   :  { %4230 = vpush %v2315_v37 }
 0xa19   :  { %4232 = vpush %v2328_v29 }
 0xa49   :  { %s4231_s13 = spop %4230 }
 0xa4a   :  { %v2317_v63 = vstv %s4231_s13  ;;  %s4233_s14 = spop %4232 }
 0xa4b   :  { %v2330_v31 = vstv %s4233_s14  ;;  %v2331_v44 = vsub.f32 %v2303_v5, %v2317_v63  ;;  %v2332_v32 = vsub.f32 %v2304_v3, %v2317_v63 }
 0xa4c   :  { %v2333_v53 = vsub.f32 %v2330_v31, %v2317_v63 }
 0xa4e   :  { %v2334_v54 = vadd.f32 1e-09, %v2333_v53 }
 0xa50   :  { %4292 = vrcp.f32 %v2334_v54 }
 0xa5a   :  { %v4293_v33 = vpop.eup %4292 }
 0xa5b   :  { %v2336_v0 = vmul.f32 %v4293_v33, %v2331_v44  ;;  %v2337_v56 = vmul.f32 %v4293_v33, %v2332_v32 }
 0xa5d   :  { %v4938_v36 = vmul.f32 3.1415927, %v2336_v0  ;;  %v4940_v22 = vmul.f32 3.1415927, %v2337_v56 }
 0xa5f   :  { %v2343_v39 = vand.u32 2139095040, %v4938_v36  ;;  %v2446_v46 = vand.u32 2139095040, %v4940_v22  ;;  %v2340_v52 = vand.u32 2147483647, %v4938_v36  ;;  %v2443_v59 = vand.u32 2147483647, %v4940_v22 }
 0xa61   :  { %v2344_v11 = vshrl.u32 %v2343_v39, 23  ;;  %v2447_v21 = vshrl.u32 %v2446_v46, 23  ;;  %v2347_v48 = vand.u32 8388607, %v2340_v52  ;;  %v2450_v49 = vand.u32 8388607, %v2443_v59 }
 0xa63   :  { %v3664_v35 = vadd.s32 4294967169, %v2344_v11  ;;  %v3668_v40 = vadd.s32 4294967169, %v2447_v21  ;;  %v2348_v61 = vor.u32 8388608, %v2347_v48  ;;  %v2451_v50 = vor.u32 8388608, %v2450_v49 }
 0xa65   :  { %v2350_v42 = vadd.s32 1, %v3664_v35  ;;  %v2453_v47 = vadd.s32 1, %v3668_v40  ;;  %v4952_v8 = vshll.u32 %v2348_v61, 8  ;;  %v4954_v9 = vshll.u32 %v2451_v50, 8 }
 0xa67   :  { %vm2351_vm6 = vcmp.gt.s32.totalorder %v2350_v42, 0  ;;  %vm2454_vm7 = vcmp.gt.s32.totalorder %v2453_v47, 0 }
 0xa68   :  { %v2352_v51 = vsel %vm2351_vm6, %v2350_v42, 0  ;;  %v2455_v60 = vsel %vm2454_vm7, %v2453_v47, 0 }
 0xa69   :  { %v2354_v62 = vand.u32 31, %v2352_v51  ;;  %v2457_v3 = vand.u32 31, %v2455_v60  ;;  %v2353_v5 = vshrl.u32 %v2352_v51, 5  ;;  %v4950_v19 = vshrl.u32 %v2455_v60, 5 }
 0xa6b   :  { %v2355_v15 = vsub.s32 32, %v2354_v62  ;;  %v2458_v12 = vsub.s32 32, %v2457_v3  ;;  %v2357_v13 = vshll.u32 %v4322_v2, %v2354_v62  ;;  %v2360_v55 = vshll.u32 %v4323_v4, %v2354_v62 }
 0xa6c   :  { %v2363_v45 = vshll.u32 %v4324_v6, %v2354_v62  ;;  %v2366_v58 = vshll.u32 %v4325_v10, %v2354_v62  ;;  %v2369_v25 = vshll.u32 %v4326_v14, %v2354_v62  ;;  %vm2372_vm8 = vcmp.lt.s32.totalorder %v2353_v5, 1 }
 0xa6d   :  { %v2358_v18 = vshrl.u32 %v4323_v4, %v2355_v15  ;;  %v2361_v43 = vshrl.u32 %v4324_v6, %v2355_v15  ;;  %v2364_v1 = vshrl.u32 %v4325_v10, %v2355_v15  ;;  %v2367_v24 = vshrl.u32 %v4326_v14, %v2355_v15 }
 0xa6e   :  { %v2370_v16 = vshrl.u32 %v4327_v17, %v2355_v15  ;;  %v2356_v26 = vshrl.u32 %v4322_v2, %v2355_v15  ;;  %vm2374_vm9 = vcmp.lt.s32.totalorder %v2353_v5, 3  ;;  %vm2375_vm10 = vcmp.lt.s32.totalorder %v2353_v5, 4 }
 0xa6f   :  { %v2359_v27 = vor.u32 %v2358_v18, %v2357_v13  ;;  %v2362_v20 = vor.u32 %v2361_v43, %v2360_v55  ;;  %v2365_v37 = vor.u32 %v2364_v1, %v2363_v45  ;;  %v2368_v29 = vor.u32 %v2367_v24, %v2366_v58 }
 0xa70   :  { %v2371_v63 = vor.u32 %v2370_v16, %v2369_v25  ;;  %v2461_v56 = vshrl.u32 %v4323_v4, %v2458_v12  ;;  %vm2373_vm11 = vcmp.lt.s32.totalorder %v2353_v5, 2  ;;  %v2460_v11 = vshll.u32 %v4322_v2, %v2457_v3 }
 0xa71   :  { %v2376_v31 = vsel %vm2372_vm8, %v2356_v26, %v2359_v27  ;;  %v2377_v53 = vsel %vm2375_vm10, %v2365_v37, 2102212464  ;;  %v2380_v54 = vsel %vm2372_vm8, %v2359_v27, %v2362_v20  ;;  %v2384_v44 = vsel %vm2372_vm8, %v2362_v20, %v2365_v37 }
 0xa72   :  { %v2378_v32 = vsel %vm2374_vm9, %v2362_v20, %v2377_v53  ;;  %v2381_v33 = vsel %vm2375_vm10, %v2368_v29, 920167782  ;;  %v2385_v0 = vsel %vm2375_vm10, %v2371_v63, 1326507024  ;;  %v2463_v48 = vshll.u32 %v4323_v4, %v2457_v3 }
 0xa73   :  { %v2382_v39 = vsel %vm2374_vm9, %v2365_v37, %v2381_v33  ;;  %v2386_v46 = vsel %vm2374_vm9, %v2368_v29, %v2385_v0  ;;  %v2379_v21 = vsel %vm2373_vm11, %v2376_v31, %v2378_v32  ;;  %v2462_v50 = vor.u32 %v2461_v56, %v2460_v11 }
 0xa74   :  { %v2383_v35 = vsel %vm2373_vm11, %v2380_v54, %v2382_v39  ;;  %v2387_v40 = vsel %vm2373_vm11, %v2384_v44, %v2386_v46  ;;  %v2464_v51 = vshrl.u32 %v4324_v6, %v2458_v12  ;;  %v2466_v60 = vshll.u32 %v4324_v6, %v2457_v3 }
 0xa75   :  { %v4971_v49 = vmul.u32.u64.low %v4952_v8, %v2387_v40  ;;  %v4972_v42 = vmul.u32.u64.high %v4952_v8, %v2387_v40, %v4971_v49  ;;  %v4975_v47 = vmul.u32.u64.low %v4952_v8, %v2383_v35  ;;  %v4976_v61 = vmul.u32.u64.high %v4952_v8, %v2383_v35, %v4975_v47 }
 0xa76   :  { %v2467_v62 = vshrl.u32 %v4325_v10, %v2458_v12  ;;  %v2459_v5 = vshrl.u32 %v4322_v2, %v2458_v12  ;;  %v2469_v15 = vshll.u32 %v4325_v10, %v2457_v3  ;;  %v2470_v13 = vshrl.u32 %v4326_v14, %v2458_v12 }
 0xa77   :  { %v2473_v55 = vshrl.u32 %v4327_v17, %v2458_v12  ;;  %v2395_v45 = vmul.u32 %v4952_v8, %v2379_v21  ;;  %v2465_v18 = vor.u32 %v2464_v51, %v2463_v48  ;;  %v2472_v1 = vshll.u32 %v4326_v14, %v2457_v3 }
 0xa78   :  { %v2468_v43 = vor.u32 %v2467_v62, %v2466_v60  ;;  %vm2397_vm12 = vc.u32 %v4972_v42, %v4975_v47  ;;  %v2398_v58 = vadd.s32 1, %v4976_v61  ;;  %v2471_v24 = vor.u32 %v2470_v13, %v2469_v15 }
 0xa79   :  { %vm2475_vm13 = vcmp.lt.s32.totalorder %v4950_v19, 1  ;;  %v2474_v25 = vor.u32 %v2473_v55, %v2472_v1  ;;  %vm2477_vm14 = vcmp.lt.s32.totalorder %v4950_v19, 3  ;;  %vm2478_vm15 = vcmp.lt.s32.totalorder %v4950_v19, 4 }
 0xa7a   :  { %v2483_v16 = vsel %vm2475_vm13, %v2462_v50, %v2465_v18  ;;  %v2399_v12 = vsel %vm2397_vm12, %v2398_v58, %v4976_v61  ;;  %v2480_v8 = vsel %vm2478_vm15, %v2468_v43, 2102212464  ;;  %v2484_v26 = vsel %vm2478_vm15, %v2471_v24, 920167782 }
 0xa7b   :  { %v2487_v27 = vsel %vm2475_vm13, %v2465_v18, %v2468_v43  ;;  %v2400_v20 = vadd.s32 %v2399_v12, %v2395_v45  ;;  %vm2476_vm4 = vcmp.lt.s32.totalorder %v4950_v19, 2  ;;  %v2485_v3 = vsel %vm2477_vm14, %v2468_v43, %v2484_v26 }
 0xa7c   :  { %v2488_v37 = vsel %vm2478_vm15, %v2474_v25, 1326507024  ;;  %v2479_v29 = vsel %vm2475_vm13, %v2459_v5, %v2462_v50  ;;  %v2481_v63 = vsel %vm2477_vm14, %v2465_v18, %v2480_v8  ;;  %v2486_v31 = vsel %vm2476_vm4, %v2483_v16, %v2485_v3 }
 0xa7d   :  { %v2489_v53 = vsel %vm2477_vm14, %v2471_v24, %v2488_v37  ;;  %v2401_v54 = vadd.s32 536870912, %v2400_v20  ;;  %v4995_v32 = vmul.u32.u64.low %v4954_v9, %v2486_v31  ;;  %v4996_v33 = vmul.u32.u64.high %v4954_v9, %v2486_v31, %v4995_v32 }
 0xa7e   :  { %v2490_v44 = vsel %vm2476_vm4, %v2487_v27, %v2489_v53  ;;  %v2482_v46 = vsel %vm2476_vm4, %v2479_v29, %v2481_v63  ;;  %v2396_v45 = vadd.s32 %v4975_v47, %v4972_v42  ;;  %vm2342_vm8 = vcmp.lt.s32.totalorder %v4938_v36, 0 }
 0xa7f   :  { %v4999_v0 = vmul.u32.u64.low %v4954_v9, %v2490_v44  ;;  %v5000_v56 = vmul.u32.u64.high %v4954_v9, %v2490_v44, %v4999_v0  ;;  %v2402_v39 = vshrl.u32 %v2401_v54, 30  ;;  %v2501_v19 = vadd.s32 1, %v4996_v33 }
 0xa80   :  { %v2498_v21 = vmul.u32 %v4954_v9, %v2482_v46  ;;  %vm5011_vm9 = vcmp.le.f32.partialorder %v2340_v52, 0.7853982  ;;  %vm2445_vm10 = vcmp.lt.s32.totalorder %v4940_v22, 0  ;;  %vm5023_vm11 = vcmp.le.f32.partialorder %v2443_v59, 0.7853982 }
 0xa81   :  { %v2403_v11 = vshll.u32 %v2402_v39, 30  ;;  %vm2500_vm5 = vc.u32 %v5000_v56, %v4995_v32  ;;  %v2499_v37 = vadd.s32 %v4995_v32, %v5000_v56  ;;  %vm2432_vm15 = vweird.f32 %v4938_v36 }
 0xa82   :  { %v2502_v40 = vsel %vm2500_vm5, %v2501_v19, %v4996_v33 }
 0xa83   :  { %v2404_v35 = vsub.s32 %v2400_v20, %v2403_v11  ;;  %v2503_v48 = vadd.s32 %v2502_v40, %v2498_v21  ;;  %v2426_v11 = vsub.s32 4, %v2402_v39 }
 0xa85   :  { %v2406_v49 = vsub.s32 0, %v2404_v35  ;;  %v2504_v61 = vadd.s32 536870912, %v2503_v48 }
 0xa87   :  { %v3665_v50 = vmin.u32 %v2406_v49, %v2404_v35  ;;  %v2505_v51 = vshrl.u32 %v2504_v61, 30 }
 0xa89   :  { %v2408_v60 = vclz %v3665_v50  ;;  %v2506_v62 = vshll.u32 %v2505_v51, 30  ;;  %v2529_v50 = vsub.s32 4, %v2505_v51 }
 0xa8b   :  { %v3666_v5 = vadd.s32 4294967294, %v2408_v60  ;;  %v2507_v15 = vsub.s32 %v2503_v48, %v2506_v62 }
 0xa8d   :  { %vm3667_vm6 = vcmp.lt.s32.totalorder %v3666_v5, 0  ;;  %v2509_v55 = vsub.s32 0, %v2507_v15 }
 0xa8e   :  { %v2411_v13 = vsel %vm3667_vm6, 0, %v3666_v5 }
 0xa8f   :  { %v2412_v9 = vsub.s32 32, %v2411_v13  ;;  %v2416_v18 = vsub.s32 4294967266, %v2411_v13  ;;  %v3669_v43 = vmin.u32 %v2509_v55, %v2507_v15  ;;  %v2413_v1 = vshll.u32 %v2404_v35, %v2411_v13 }
 0xa90   :  { %v2427_v35 = vsel %vm2342_vm8, %v2426_v11, %v2402_v39  ;;  %v2530_v13 = vsel %vm2445_vm10, %v2529_v50, %v2505_v51 }
 0xa91   :  { %v2414_v58 = vshrl.u32 %v2396_v45, %v2412_v9  ;;  %v2417_v24 = vadd.s32 127, %v2416_v18  ;;  %v2511_v25 = vclz %v3669_v43  ;;  %v2429_v48 = vsel %vm5011_vm9, 0, %v2427_v35 }
 0xa92   :  { %v2433_v60 = vand.u32 3, %v2429_v48  ;;  %v2532_v9 = vsel %vm5023_vm11, 0, %v2530_v13 }
 0xa93   :  { %v2415_v16 = vor.u32 %v2414_v58, %v2413_v1  ;;  %v2418_v12 = vshll.u32 %v2417_v24, 23  ;;  %v3670_v8 = vadd.s32 4294967294, %v2511_v25  ;;  %v2536_v1 = vand.u32 3, %v2532_v9 }
 0xa94   :  { %vm2438_vm12 = vcmp.eq.s32.totalorder %v2433_v60, 2  ;;  %vm2435_vm13 = vcmp.eq.s32.totalorder %v2433_v60, 0  ;;  %vm2434_vm14 = vcmp.lt.s32.totalorder %v2433_v60, 2 }
 0xa95   :  { %v2419_v26 = vor.u32 4788187, %v2418_v12  ;;  %vm3671_vm7 = vcmp.lt.s32.totalorder %v3670_v8, 0  ;;  %v2422_v20 = vcvt.s32.f32 %v2415_v16  ;;  %vm2541_vm4 = vcmp.eq.s32.totalorder %v2536_v1, 2 }
 0xa96   :  { %v2514_v3 = vsel %vm3671_vm7, 0, %v3670_v8  ;;  %vm2538_vm5 = vcmp.eq.s32.totalorder %v2536_v1, 0  ;;  %vm2537_vm6 = vcmp.lt.s32.totalorder %v2536_v1, 2  ;;  %vm2535_vm7 = vweird.f32 %v4940_v22 }
 0xa97   :  { %v2420_v27 = vand.u32 2147483647, %v2419_v26  ;;  %v2515_v29 = vsub.s32 32, %v2514_v3  ;;  %v2519_v63 = vsub.s32 4294967266, %v2514_v3  ;;  %v2516_v47 = vshll.u32 %v2507_v15, %v2514_v3  ;;  %v3683_v3 = vld [vmem:[%s5261_s1 + $0xe8] sm:$0xff] }
 0xa99   :  { %v2423_v42 = vmul.f32 %v2422_v20, %v2420_v27  ;;  %v2517_v31 = vshrl.u32 %v2499_v37, %v2515_v29  ;;  %v2520_v53 = vadd.s32 127, %v2519_v63  ;;  %v3679_v27 = vld [vmem:[%s5261_s1 + $0xc8] sm:$0xff]  ;;  %v3682_v20 = vld [vmem:[%s5261_s1 + $0xe0] sm:$0xff]  ;;  %v3684_v37 = vld [vmem:[%s5261_s1 + $0xf0] sm:$0xff] }
 0xa9a   :  { %v5075_v63 = vld [vmem:[%s5262_s4 + $0x28] ss:$0 sm:$0xff] }
 0xa9b   :  { %v2424_v54 = vxor.u32 2147483648, %v2423_v42  ;;  %v2518_v44 = vor.u32 %v2517_v31, %v2516_v47  ;;  %v2521_v33 = vshll.u32 %v2520_v53, 23 }
 0xa9d   :  { %v2425_v46 = vsel %vm2342_vm8, %v2424_v54, %v2423_v42  ;;  %v2522_v56 = vor.u32 4788187, %v2521_v33  ;;  %v2525_v21 = vcvt.s32.f32 %v2518_v44 }
 0xa9e   :  { %v2428_v32 = vsel %vm5011_vm9, %v4938_v36, %v2425_v46  ;;  %v3678_v36 = vld [vmem:[%s5261_s1 + $0xc0] sm:$0xff] }
 0xa9f   :  { %4294 = vcosq.f32 %v2428_v32  ;;  %v2523_v19 = vand.u32 2147483647, %v2522_v56 }
 0xaa0   :  { %4296 = vsinq.f32 %v2428_v32 }
 0xaa1   :  { %v2526_v40 = vmul.f32 %v2525_v21, %v2523_v19 }
 0xaa3   :  { %v2527_v52 = vxor.u32 2147483648, %v2526_v40 }
 0xaa5   :  { %v2528_v61 = vsel %vm2445_vm10, %v2527_v52, %v2526_v40 }
 0xaa6   :  { %v2531_v39 = vsel %vm5023_vm11, %v4940_v22, %v2528_v61  ;;  %v3680_v22 = vld [vmem:[%s5261_s1 + $0xd0] sm:$0xff] }
 0xaa7   :  { %4298 = vcosq.f32 %v2531_v39 }
 0xaa8   :  { %4300 = vsinq.f32 %v2531_v39  ;;  %v3705_v39 = vld [vmem:[%s5264_s3 + $0x3] ss:$0 sm:$0xff] }
 0xaa9   :  { %v4295_v62 = vpop.eup %4294 }
 0xaaa   :  { %v4297_v5 = vpop.eup %4296  ;;  %v2439_v15 = vxor.u32 2147483648, %v4295_v62 }
 0xaab   :  { %v2436_v55 = vxor.u32 2147483648, %v4297_v5 }
 0xaac   :  { %v2440_v59 = vsel %vm2438_vm12, %v2439_v15, %v4297_v5 }
 0xaad   :  { %v2437_v45 = vsel %vm2435_vm13, %v4295_v62, %v2436_v55 }
 0xaae   :  { %v2441_v18 = vsel %vm2434_vm14, %v2437_v45, %v2440_v59 }
 0xaaf   :  { %v2442_v43 = vsel %vm2432_vm15, nan, %v2441_v18 }
 0xab0   :  { %4046 = vmatprep.mubr.msk.f32.mxu0 %vm166_vm1, %v2442_v43 }
 0xab1   :  { %v4299_v58 = vpop.eup %4298 }
 0xab2   :  { %v4301_v24 = vpop.eup %4300  ;;  %v2542_v25 = vxor.u32 2147483648, %v4299_v58 }
 0xab3   :  { %v2539_v51 = vxor.u32 2147483648, %v4301_v24 }
 0xab4   :  { %v2543_v16 = vsel %vm2541_vm4, %v2542_v25, %v4301_v24 }
 0xab5   :  { %v2540_v12 = vsel %vm2538_vm5, %v4299_v58, %v2539_v51 }
 0xab6   :  { %v2544_v8 = vsel %vm2537_vm6, %v2540_v12, %v2543_v16 }
 0xab7   :  { %v2545_v26 = vsel %vm2535_vm7, nan, %v2544_v8 }
 0xab8   :  { %4047 = vmatmul.mubr.msk.f32.vlgmr.msra.gmra.mrb[36].mxu0 %vm166_vm1, %v2545_v26 }
 0xab9   :  { %4173 = vmatpush3.bf16.msra.mxu0 %v4935_v23  ;;  %4053 = vmatprep.mubr.msk.f32.mxu0 %vm36_vm0, %v3678_v36  ;;  %v3681_v23 = vld [vmem:[%s5261_s1 + $0xd8] sm:$0xff] }
 0xaba   :  { %4073 = vmatprep.subr.mxu0 %v4814_v34 }
 0xabc   :  { %4054 = vmatmul.mubr.msk.f32.vlgmr.msra.gmra.mrb[38].mxu0 %vm36_vm0, %v3679_v27 }
 0xabd   :  { %4056 = vmatprep.mubr.msk.f32.mxu0 %vm36_vm0, %v3680_v22  ;;  %4074 = vmatpush3.msra.mxu0 %v4814_v34  ;;  %v3685_v34 = vld [vmem:[%s5261_s1 + $0xf8] sm:$0xff] }
 0xabe   :  { %4105 = vmatprep.subr.mxu0 %v4829_v41 }
 0xac0   :  { %4057 = vmatmul.mubr.msk.f32.gmra.mrb[40].mxu0 %vm36_vm0, %v3681_v23 }
 0xac1   :  { %4059 = vmatprep.mubr.msk.f32.mxu0 %vm36_vm0, %v3682_v20 }
 0xac4   :  { %4060 = vmatmul.mubr.msk.f32.gmra.mrb[42].mxu0 %vm36_vm0, %v3683_v3 }
 0xac5   :  { %4062 = vmatprep.mubr.msk.f32.mxu0 %vm36_vm0, %v3684_v37 }
 0xac8   :  { %4063 = vmatmul.mubr.msk.f32.gmra.mrb[44].mxu0 %vm36_vm0, %v3685_v34 }
 0xb8b   :  { %v4048_v29 = vpop.f32.mrb[36].mxu0 }
 0xb8c   :  { %v2624_v42 = vadd.f32 %v5075_v63, %v4048_v29  ;;  %v2618_v47 = vpop.f32.mrb[37].mxu0 }
 0xb8d   :  { %v2619_v31 = vadd.f32 %v5075_v63, %v2618_v47 }
 0xb8e   :  { %v5079_v53 = vmax.f32 %v2624_v42, 0.0 }
 0xb8f   :  { %v5081_v54 = vmax.f32 %v2619_v31, 0.0  ;;  %v4055_v44 = vpop.f32.mrb[38].mxu0 }
 0xb90   :  { %v2771_v33 = vpop.f32.mrb[39].mxu0  ;;  %v2632_v0 = vsel %vm873_vm3, %v5079_v53, -inf  ;;  %v2630_v46 = vsel %vm873_vm3, %v5079_v53, inf }
 0xb91   :  { %4067 = vmatprep.mubr.msk.f32.mxu1 %vm166_vm1, %v2771_v33  ;;  %v2631_v11 = vsel %vm873_vm3, %v5081_v54, -inf  ;;  %v2647_v32 = vsel %vm166_vm1, %v2632_v0, -inf  ;;  %v2629_v56 = vsel %vm873_vm3, %v5081_v54, inf  ;;  %v2634_v19 = vsel %vm166_vm1, %v2630_v46, inf }
 0xb92   :  { %4068 = vmatmul.mubr.msk.f32.vlgmr.msra.gmra.mrb[24].mxu1 %vm166_vm1, %v4055_v44  ;;  %v2646_v21 = vsel %vm166_vm1, %v2631_v11, -inf  ;;  %v2633_v35 = vsel %vm166_vm1, %v2629_v56, inf  ;;  %v3703_v44 = vld [vmem:[%s5263_s2 + $0x38] sm:$0xff] }
 0xb93   :  { %v4058_v40 = vpop.f32.mrb[40].mxu0  ;;  %v2648_v48 = vmax.f32 %v2646_v21, %v2647_v32  ;;  %v2635_v52 = vmin.f32 %v2633_v35, %v2634_v19  ;;  %4082 = vmatpush3.msra.mxu1 %v4873_v7 }
 0xb94   :  { %v2781_v49 = vpop.f32.mrb[41].mxu0 }
 0xb95   :  { %4070 = vmatprep.mubr.msk.f32.mxu1 %vm166_vm1, %v2781_v49  ;;  %2649 = vmax.xlane.f32.xlu1 %v2648_v48 }
 0xb96   :  { %2636 = vmin.xlane.f32.xlu0 %v2635_v52  ;;  %4071 = vmatmul.mubr.msk.f32.gmra.mrb[26].mxu1 %vm166_vm1, %v4058_v40 }
 0xb97   :  { %v4061_v61 = vpop.f32.mrb[42].mxu0  ;;  %4083 = vmatprep.mubr.msk.f32.mxu1 %vm166_vm1, %v4926_v38  ;;  %v3702_v38 = vld [vmem:[%s5263_s2 + $0x30] sm:$0xff] }
 0xb98   :  { %v2791_v50 = vpop.f32.mrb[43].mxu0  ;;  %v3015_v62 = vmul.f32 %v3705_v39, %v3702_v38 }
 0xb99   :  { %4075 = vmatprep.mubr.msk.f32.mxu0 %vm166_vm1, %v2791_v50 }
 0xb9a   :  { %4076 = vmatmul.mubr.msk.f32.vlgmr.msra.gmra.mrb[46].mxu0 %vm166_vm1, %v4061_v61  ;;  %4084 = vmatmul.mubr.msk.f32.vlgmr.msra.gmra.mrb[28].mxu1 %vm166_vm1, %v4931_v28 }
 0xb9b   :  { %v4064_v7 = vpop.f32.mrb[44].mxu0  ;;  %4106 = vmatpush3.msra.mxu0 %v4829_v41  ;;  %4102 = vmatprep.mubr.msk.f32.mxu1 %vm453_vm2, %v3015_v62 }
 0xb9c   :  { %v2801_v60 = vpop.f32.mrb[45].mxu0 }
 0xb9d   :  { %4078 = vmatprep.mubr.msk.f32.mxu0 %vm166_vm1, %v2801_v60 }
 0xb9e   :  { %4079 = vmatmul.mubr.msk.f32.gmra.mrb[48].mxu0 %vm166_vm1, %v4064_v7 }
 0xc22   :  { %v2650_v28 = vpop.xlane.xlu1 %2649 }
 0xc23   :  { %v2651_v5 = vrot.slane %v2650_v28, 4  ;;  %v2637_v15 = vpop.xlane.xlu0 %2636 }
 0xc24   :  { %v2638_v41 = vrot.slane %v2637_v15, 4 }
 0xc25   :  { %v2652_v13 = vmax.f32 %v2650_v28, %v2651_v5 }
 0xc26   :  { %v2639_v55 = vmin.f32 %v2637_v15, %v2638_v41 }
 0xc27   :  { %v2653_v59 = vrot.slane %v2652_v13, 2 }
 0xc28   :  { %v2640_v45 = vrot.slane %v2639_v55, 2 }
 0xc29   :  { %v2654_v9 = vmax.f32 %v2652_v13, %v2653_v59 }
 0xc2a   :  { %v2641_v18 = vmin.f32 %v2639_v55, %v2640_v45 }
 0xc2b   :  { %v2655_v43 = vrot.slane %v2654_v9, 1 }
 0xc2c   :  { %v2642_v1 = vrot.slane %v2641_v18, 1 }
 0xc2d   :  { %v2656_v58 = vmax.f32 %v2654_v9, %v2655_v43 }
 0xc2e   :  { %v2643_v24 = vmin.f32 %v2641_v18, %v2642_v1 }
 0xc30   :  { %4242 = vpush %v2643_v24 }
 0xc31   :  { %4244 = vpush %v2656_v58 }
 0xc61   :  { %s4243_s3 = spop %4242 }
 0xc62   :  { %v2645_v25 = vstv %s4243_s3  ;;  %s4245_s9 = spop %4244 }
 0xc63   :  { %v2658_v51 = vstv %s4245_s9  ;;  %v2659_v34 = vsub.f32 %v5081_v54, %v2645_v25  ;;  %v2660_v29 = vsub.f32 %v5079_v53, %v2645_v25  ;;  %v3016_v53 = vmul.f32 %v3705_v39, %v3703_v44 }
 0xc64   :  { %v2661_v16 = vsub.f32 %v2658_v51, %v2645_v25 }
 0xc65   :  { %v4069_v12 = vpop.f32.mrb[24].mxu1 }
 0xc66   :  { %v2662_v8 = vadd.f32 1e-09, %v2661_v16  ;;  %v2888_v36 = vpop.f32.mrb[25].mxu1 }
 0xc67   :  { %v4174_v26 = vpack.c.bf16 %v4069_v12, %v2888_v36 }
 0xc68   :  { %4302 = vrcp.f32 %v2662_v8 }
 0xc69   :  { %v4072_v27 = vpop.f32.mrb[26].mxu1  ;;  %4175 = vmatprep.subr.bf16.mxu1 %v4174_v26 }
 0xc6a   :  { %v2898_v22 = vpop.f32.mrb[27].mxu1  ;;  %4177 = vmatpush3.bf16.msra.mxu1 %v4174_v26 }
 0xc6b   :  { %v4178_v23 = vpack.c.bf16 %v4072_v27, %v2898_v22 }
 0xc6d   :  { %v4077_v20 = vpop.f32.mrb[46].mxu0  ;;  %4179 = vmatprep.subr.bf16.mxu1 %v4178_v23 }
 0xc6e   :  { %v2985_v3 = vpop.f32.mrb[47].mxu0  ;;  %4181 = vmatpush3.bf16.msra.mxu1 %v4178_v23 }
 0xc6f   :  { %v4182_v37 = vpack.c.bf16 %v4077_v20, %v2985_v3 }
 0xc71   :  { %v4080_v42 = vpop.f32.mrb[48].mxu0  ;;  %4183 = vmatprep.subr.bf16.mxu1 %v4182_v37 }
 0xc72   :  { %v4303_v47 = vpop.eup %4302  ;;  %v2995_v31 = vpop.f32.mrb[49].mxu0  ;;  %4185 = vmatpush3.bf16.msra.mxu1 %v4182_v37 }
 0xc73   :  { %v2664_v33 = vmul.f32 %v4303_v47, %v2659_v34  ;;  %v2665_v0 = vmul.f32 %v4303_v47, %v2660_v29  ;;  %v4186_v46 = vpack.c.bf16 %v4080_v42, %v2995_v31 }
 0xc75   :  { %3674 = vst.msk [vmem:[%s5265_s5 + $0x20] sm:$0xff] %vm166_vm1, %v2664_v33  ;;  %3675 = vst.msk [vmem:[%s5265_s5 + $0x28] sm:$0xff] %vm166_vm1, %v2665_v0  ;;  %4187 = vmatprep.subr.bf16.mxu1 %v4186_v46 }
 0xc76   :  { %4189 = vmatpush3.bf16.msra.mxu1 %v4186_v46 }
 0xc79   :  { %4103 = vmatmul.mubr.msk.f32.vlgmr.msra.gmra.mrb[28].mxu1 %vm453_vm2, %v3016_v53 }
 0xd4c   :  { %v4104_v54 = vpop.f32.mrb[28].mxu1 }
 0xd4d   :  { %v3180_v11 = vadd.f32 %v4915_v57, %v4104_v54  ;;  %v3170_v32 = vpop.f32.mrb[29].mxu1 }
 0xd4e   :  { %v3179_v56 = vadd.f32 %v4915_v57, %v3170_v32 }
 0xd4f   :  { %v3182_v19 = vmax.f32 %v3180_v11, 0.0 }
 0xd50   :  { %v3181_v21 = vmax.f32 %v3179_v56, 0.0 }
 0xd51   :  { %v3197_v35 = vsel %vm166_vm1, %v3182_v19, -inf  ;;  %v3184_v40 = vsel %vm166_vm1, %v3182_v19, inf }
 0xd52   :  { %v3196_v48 = vsel %vm166_vm1, %v3181_v21, -inf  ;;  %v3183_v52 = vsel %vm166_vm1, %v3181_v21, inf }
 0xd53   :  { %v3198_v49 = vmax.f32 %v3196_v48, %v3197_v35  ;;  %v3185_v61 = vmin.f32 %v3183_v52, %v3184_v40 }
 0xd55   :  { %3199 = vmax.xlane.f32.xlu1 %v3198_v49  ;;  %3186 = vmin.xlane.f32.xlu0 %v3185_v61 }
 0xde2   :  { %v3200_v50 = vpop.xlane.xlu1 %3199  ;;  %v3187_v7 = vpop.xlane.xlu0 %3186 }
 0xde3   :  { %v3201_v60 = vrot.slane %v3200_v50, 4  ;;  %v3188_v38 = vrot.slane %v3187_v7, 4 }
 0xde5   :  { %v3202_v39 = vmax.f32 %v3200_v50, %v3201_v60  ;;  %v3189_v57 = vmin.f32 %v3187_v7, %v3188_v38 }
 0xde7   :  { %v3203_v62 = vrot.slane %v3202_v39, 2  ;;  %v3190_v28 = vrot.slane %v3189_v57, 2 }
 0xde9   :  { %v3191_v5 = vmin.f32 %v3189_v57, %v3190_v28  ;;  %v3204_v15 = vmax.f32 %v3202_v39, %v3203_v62 }
 0xdeb   :  { %v3192_v41 = vrot.slane %v3191_v5, 1  ;;  %v3205_v13 = vrot.slane %v3204_v15, 1 }
 0xded   :  { %v3193_v55 = vmin.f32 %v3191_v5, %v3192_v41  ;;  %v3206_v59 = vmax.f32 %v3204_v15, %v3205_v13 }
 0xdef   :  { %4246 = vpush %v3193_v55 }
 0xdf0   :  { %4248 = vpush %v3206_v59 }
 0xe20   :  { %s4247_s2 = spop %4246 }
 0xe21   :  { %v3195_v45 = vstv %s4247_s2  ;;  %s4249_s15 = spop %4248 }
 0xe22   :  { %v3208_v9 = vstv %s4249_s15  ;;  %v3209_v1 = vsub.f32 %v3181_v21, %v3195_v45  ;;  %v3210_v58 = vsub.f32 %v3182_v19, %v3195_v45 }
 0xe23   :  { %v3211_v18 = vsub.f32 %v3208_v9, %v3195_v45 }
 0xe25   :  { %v3212_v43 = vadd.f32 1e-09, %v3211_v18 }
 0xe27   :  { %4304 = vrcp.f32 %v3212_v43 }
 0xe31   :  { %v4305_v24 = vpop.eup %4304 }
 0xe32   :  { %v3214_v25 = vmul.f32 %v4305_v24, %v3209_v1  ;;  %v3215_v51 = vmul.f32 %v4305_v24, %v3210_v58 }
 0xe34   :  { %v5140_v16 = vmul.f32 3.1415927, %v3214_v25  ;;  %v5142_v12 = vmul.f32 3.1415927, %v3215_v51 }
 0xe36   :  { %v3221_v8 = vand.u32 2139095040, %v5140_v16  ;;  %v3324_v36 = vand.u32 2139095040, %v5142_v12  ;;  %v3218_v26 = vand.u32 2147483647, %v5140_v16  ;;  %v3321_v27 = vand.u32 2147483647, %v5142_v12 }
 0xe38   :  { %v3222_v22 = vshrl.u32 %v3221_v8, 23  ;;  %v3325_v23 = vshrl.u32 %v3324_v36, 23  ;;  %v3225_v37 = vand.u32 8388607, %v3218_v26  ;;  %v3328_v34 = vand.u32 8388607, %v3321_v27 }
 0xe3a   :  { %v3710_v20 = vadd.s32 4294967169, %v3222_v22  ;;  %v3714_v3 = vadd.s32 4294967169, %v3325_v23  ;;  %v3226_v47 = vor.u32 8388608, %v3225_v37  ;;  %v3329_v31 = vor.u32 8388608, %v3328_v34 }
 0xe3c   :  { %v3228_v29 = vadd.s32 1, %v3710_v20  ;;  %v3331_v42 = vadd.s32 1, %v3714_v3  ;;  %v5154_v32 = vshll.u32 %v3226_v47, 8  ;;  %v5156_v56 = vshll.u32 %v3329_v31, 8 }
 0xe3e   :  { %vm3229_vm0 = vcmp.gt.s32.totalorder %v3228_v29, 0  ;;  %vm3332_vm2 = vcmp.gt.s32.totalorder %v3331_v42, 0 }
 0xe3f   :  { %v3230_v44 = vsel %vm3229_vm0, %v3228_v29, 0  ;;  %v3333_v33 = vsel %vm3332_vm2, %v3331_v42, 0  ;;  %vm3220_vm0 = vcmp.lt.s32.totalorder %v5140_v16, 0  ;;  %vm5213_vm2 = vcmp.le.f32.partialorder %v3218_v26, 0.7853982 }
 0xe40   :  { %v3232_v0 = vand.u32 31, %v3230_v44  ;;  %v3335_v46 = vand.u32 31, %v3333_v33  ;;  %v3231_v53 = vshrl.u32 %v3230_v44, 5  ;;  %v5152_v54 = vshrl.u32 %v3333_v33, 5 }
 0xe42   :  { %v3233_v11 = vsub.s32 32, %v3232_v0  ;;  %v3336_v19 = vsub.s32 32, %v3335_v46  ;;  %v3235_v21 = vshll.u32 %v4322_v2, %v3232_v0  ;;  %v3238_v35 = vshll.u32 %v4323_v4, %v3232_v0 }
 0xe43   :  { %v3241_v40 = vshll.u32 %v4324_v6, %v3232_v0  ;;  %v3244_v61 = vshll.u32 %v4325_v10, %v3232_v0  ;;  %v3247_v7 = vshll.u32 %v4326_v14, %v3232_v0  ;;  %vm3250_vm8 = vcmp.lt.s32.totalorder %v3231_v53, 1 }
 0xe44   :  { %v3236_v48 = vshrl.u32 %v4323_v4, %v3233_v11  ;;  %v3239_v52 = vshrl.u32 %v4324_v6, %v3233_v11  ;;  %v3242_v49 = vshrl.u32 %v4325_v10, %v3233_v11  ;;  %v3245_v50 = vshrl.u32 %v4326_v14, %v3233_v11 }
 0xe45   :  { %v3248_v60 = vshrl.u32 %v4327_v17, %v3233_v11  ;;  %v3234_v38 = vshrl.u32 %v4322_v2, %v3233_v11  ;;  %vm3252_vm9 = vcmp.lt.s32.totalorder %v3231_v53, 3  ;;  %vm3253_vm10 = vcmp.lt.s32.totalorder %v3231_v53, 4 }
 0xe46   :  { %v3237_v39 = vor.u32 %v3236_v48, %v3235_v21  ;;  %v3240_v57 = vor.u32 %v3239_v52, %v3238_v35  ;;  %v3243_v62 = vor.u32 %v3242_v49, %v3241_v40  ;;  %v3246_v28 = vor.u32 %v3245_v50, %v3244_v61 }
 0xe47   :  { %v3249_v5 = vor.u32 %v3248_v60, %v3247_v7  ;;  %v3339_v18 = vshrl.u32 %v4323_v4, %v3336_v19  ;;  %vm3251_vm11 = vcmp.lt.s32.totalorder %v3231_v53, 2  ;;  %v3338_v58 = vshll.u32 %v4322_v2, %v3335_v46 }
 0xe48   :  { %v3254_v15 = vsel %vm3250_vm8, %v3234_v38, %v3237_v39  ;;  %v3255_v41 = vsel %vm3253_vm10, %v3243_v62, 2102212464  ;;  %v3258_v13 = vsel %vm3250_vm8, %v3237_v39, %v3240_v57  ;;  %v3262_v55 = vsel %vm3250_vm8, %v3240_v57, %v3243_v62 }
 0xe49   :  { %v3256_v59 = vsel %vm3252_vm9, %v3240_v57, %v3255_v41  ;;  %v3259_v45 = vsel %vm3253_vm10, %v3246_v28, 920167782  ;;  %v3263_v9 = vsel %vm3253_vm10, %v3249_v5, 1326507024  ;;  %v3341_v8 = vshll.u32 %v4323_v4, %v3335_v46 }
 0xe4a   :  { %v3260_v43 = vsel %vm3252_vm9, %v3243_v62, %v3259_v45  ;;  %v3264_v1 = vsel %vm3252_vm9, %v3246_v28, %v3263_v9  ;;  %v3257_v24 = vsel %vm3251_vm11, %v3254_v15, %v3256_v59  ;;  %v3340_v3 = vor.u32 %v3339_v18, %v3338_v58 }
 0xe4b   :  { %v3261_v25 = vsel %vm3251_vm11, %v3258_v13, %v3260_v43  ;;  %v3265_v51 = vsel %vm3251_vm11, %v3262_v55, %v3264_v1  ;;  %v3342_v37 = vshrl.u32 %v4324_v6, %v3336_v19  ;;  %v3344_v34 = vshll.u32 %v4324_v6, %v3335_v46 }
 0xe4c   :  { %v5173_v36 = vmul.u32.u64.low %v5154_v32, %v3265_v51  ;;  %v5174_v22 = vmul.u32.u64.high %v5154_v32, %v3265_v51, %v5173_v36  ;;  %v5177_v23 = vmul.u32.u64.low %v5154_v32, %v3261_v25  ;;  %v5178_v20 = vmul.u32.u64.high %v5154_v32, %v3261_v25, %v5177_v23 }
 0xe4d   :  { %v3345_v29 = vshrl.u32 %v4325_v10, %v3336_v19  ;;  %v3337_v42 = vshrl.u32 %v4322_v2, %v3336_v19  ;;  %v3347_v47 = vshll.u32 %v4325_v10, %v3335_v46  ;;  %v3348_v4 = vshrl.u32 %v4326_v14, %v3336_v19 }
 0xe4e   :  { %v3351_v31 = vshrl.u32 %v4327_v17, %v3336_v19  ;;  %v3273_v44 = vmul.u32 %v5154_v32, %v3257_v24  ;;  %v3343_v33 = vor.u32 %v3342_v37, %v3341_v8  ;;  %v3350_v53 = vshll.u32 %v4326_v14, %v3335_v46 }
 0xe4f   :  { %v3346_v0 = vor.u32 %v3345_v29, %v3344_v34  ;;  %vm3275_vm12 = vc.u32 %v5174_v22, %v5177_v23  ;;  %v3276_v6 = vadd.s32 1, %v5178_v20  ;;  %v3349_v11 = vor.u32 %v3348_v4, %v3347_v47 }
 0xe50   :  { %vm3353_vm13 = vcmp.lt.s32.totalorder %v5152_v54, 1  ;;  %v3352_v2 = vor.u32 %v3351_v31, %v3350_v53  ;;  %vm3355_vm14 = vcmp.lt.s32.totalorder %v5152_v54, 3  ;;  %vm3356_vm15 = vcmp.lt.s32.totalorder %v5152_v54, 4 }
 0xe51   :  { %v3361_v10 = vsel %vm3353_vm13, %v3340_v3, %v3343_v33  ;;  %v3277_v17 = vsel %vm3275_vm12, %v3276_v6, %v5178_v20  ;;  %v3358_v32 = vsel %vm3356_vm15, %v3346_v0, 2102212464  ;;  %v3362_v19 = vsel %vm3356_vm15, %v3349_v11, 920167782 }
 0xe52   :  { %v3365_v21 = vsel %vm3353_vm13, %v3343_v33, %v3346_v0  ;;  %v3278_v35 = vadd.s32 %v3277_v17, %v3273_v44  ;;  %vm3354_vm4 = vcmp.lt.s32.totalorder %v5152_v54, 2  ;;  %v3363_v14 = vsel %vm3355_vm14, %v3346_v0, %v3362_v19 }
 0xe53   :  { %v3366_v46 = vsel %vm3356_vm15, %v3352_v2, 1326507024  ;;  %v3357_v40 = vsel %vm3353_vm13, %v3337_v42, %v3340_v3  ;;  %v3359_v48 = vsel %vm3355_vm14, %v3343_v33, %v3358_v32  ;;  %v3364_v52 = vsel %vm3354_vm4, %v3361_v10, %v3363_v14 }
 0xe54   :  { %v3367_v49 = vsel %vm3355_vm14, %v3349_v11, %v3366_v46  ;;  %v3279_v61 = vadd.s32 536870912, %v3278_v35  ;;  %v5197_v7 = vmul.u32.u64.low %v5156_v56, %v3364_v52  ;;  %v5198_v60 = vmul.u32.u64.high %v5156_v56, %v3364_v52, %v5197_v7 }
 0xe55   :  { %v3368_v50 = vsel %vm3354_vm4, %v3365_v21, %v3367_v49  ;;  %v3360_v62 = vsel %vm3354_vm4, %v3357_v40, %v3359_v48  ;;  %v3274_v51 = vadd.s32 %v5177_v23, %v5174_v22  ;;  %vm3323_vm8 = vcmp.lt.s32.totalorder %v5142_v12, 0 }
 0xe56   :  { %v5201_v38 = vmul.u32.u64.low %v5156_v56, %v3368_v50  ;;  %v5202_v39 = vmul.u32.u64.high %v5156_v56, %v3368_v50, %v5201_v38  ;;  %v3280_v57 = vshrl.u32 %v3279_v61, 30  ;;  %v3379_v54 = vadd.s32 1, %v5198_v60 }
 0xe57   :  { %v3376_v5 = vmul.u32 %v5156_v56, %v3360_v62  ;;  %vm5225_vm9 = vcmp.le.f32.partialorder %v3321_v27, 0.7853982  ;;  %vm3310_vm13 = vweird.f32 %v5140_v16 }
 0xe58   :  { %v3281_v28 = vshll.u32 %v3280_v57, 30  ;;  %vm3378_vm5 = vc.u32 %v5202_v39, %v5197_v7  ;;  %v3377_v0 = vadd.s32 %v5197_v7, %v5202_v39 }
 0xe59   :  { %v3380_v41 = vsel %vm3378_vm5, %v3379_v54, %v5198_v60  ;;  %vm3413_vm5 = vweird.f32 %v5142_v12 }
 0xe5a   :  { %v3282_v15 = vsub.s32 %v3278_v35, %v3281_v28  ;;  %v3381_v13 = vadd.s32 %v3380_v41, %v3376_v5  ;;  %v3304_v35 = vsub.s32 4, %v3280_v57 }
 0xe5c   :  { %v3284_v55 = vsub.s32 0, %v3282_v15  ;;  %v3382_v59 = vadd.s32 536870912, %v3381_v13  ;;  %v3305_v52 = vsel %vm3220_vm0, %v3304_v35, %v3280_v57 }
 0xe5d   :  { %v3307_v61 = vsel %vm5213_vm2, 0, %v3305_v52 }
 0xe5e   :  { %v3711_v45 = vmin.u32 %v3284_v55, %v3282_v15  ;;  %v3383_v9 = vshrl.u32 %v3382_v59, 30  ;;  %v3311_v38 = vand.u32 3, %v3307_v61 }
 0xe60   :  { %v3286_v18 = vclz %v3711_v45  ;;  %v3384_v43 = vshll.u32 %v3383_v9, 30  ;;  %v3407_v60 = vsub.s32 4, %v3383_v9  ;;  %vm3316_vm10 = vcmp.eq.s32.totalorder %v3311_v38, 2 }
 0xe61   :  { %vm3313_vm11 = vcmp.eq.s32.totalorder %v3311_v38, 0  ;;  %vm3312_vm12 = vcmp.lt.s32.totalorder %v3311_v38, 2 }
 0xe62   :  { %v3712_v1 = vadd.s32 4294967294, %v3286_v18  ;;  %v3385_v58 = vsub.s32 %v3381_v13, %v3384_v43  ;;  %v3408_v54 = vsel %vm3323_vm8, %v3407_v60, %v3383_v9 }
 0xe63   :  { %v3410_v41 = vsel %vm5225_vm9, 0, %v3408_v54 }
 0xe64   :  { %vm3713_vm6 = vcmp.lt.s32.totalorder %v3712_v1, 0  ;;  %v3387_v25 = vsub.s32 0, %v3385_v58  ;;  %v3414_v59 = vand.u32 3, %v3410_v41 }
 0xe65   :  { %v3289_v24 = vsel %vm3713_vm6, 0, %v3712_v1 }
 0xe66   :  { %v3290_v56 = vsub.s32 32, %v3289_v24  ;;  %v3294_v8 = vsub.s32 4294967266, %v3289_v24  ;;  %v3715_v36 = vmin.u32 %v3387_v25, %v3385_v58  ;;  %v3291_v20 = vshll.u32 %v3282_v15, %v3289_v24 }
 0xe67   :  { %vm3419_vm14 = vcmp.eq.s32.totalorder %v3414_v59, 2  ;;  %vm3416_vm15 = vcmp.eq.s32.totalorder %v3414_v59, 0  ;;  %vm3415_vm4 = vcmp.lt.s32.totalorder %v3414_v59, 2 }
 0xe68   :  { %v3292_v3 = vshrl.u32 %v3274_v51, %v3290_v56  ;;  %v3295_v37 = vadd.s32 127, %v3294_v8  ;;  %v3389_v34 = vclz %v3715_v36 }
 0xe6a   :  { %v3293_v29 = vor.u32 %v3292_v3, %v3291_v20  ;;  %v3296_v42 = vshll.u32 %v3295_v37, 23  ;;  %v3716_v47 = vadd.s32 4294967294, %v3389_v34 }
 0xe6c   :  { %v3297_v4 = vor.u32 4788187, %v3296_v42  ;;  %vm3717_vm7 = vcmp.lt.s32.totalorder %v3716_v47, 0  ;;  %v3300_v44 = vcvt.s32.f32 %v3293_v29 }
 0xe6d   :  { %v3392_v33 = vsel %vm3717_vm7, 0, %v3716_v47 }
 0xe6e   :  { %v3298_v31 = vand.u32 2147483647, %v3297_v4  ;;  %v3393_v53 = vsub.s32 32, %v3392_v33  ;;  %v3397_v6 = vsub.s32 4294967266, %v3392_v33  ;;  %v3394_v23 = vshll.u32 %v3385_v58, %v3392_v33 }
 0xe70   :  { %v3301_v22 = vmul.f32 %v3300_v44, %v3298_v31  ;;  %v3395_v11 = vshrl.u32 %v3377_v0, %v3393_v53  ;;  %v3398_v2 = vadd.s32 127, %v3397_v6 }
 0xe72   :  { %v3302_v10 = vxor.u32 2147483648, %v3301_v22  ;;  %v3396_v17 = vor.u32 %v3395_v11, %v3394_v23  ;;  %v3399_v32 = vshll.u32 %v3398_v2, 23 }
 0xe74   :  { %v3303_v21 = vsel %vm3220_vm0, %v3302_v10, %v3301_v22  ;;  %v3400_v46 = vor.u32 4788187, %v3399_v32  ;;  %v3403_v48 = vcvt.s32.f32 %v3396_v17 }
 0xe75   :  { %v3306_v14 = vsel %vm5213_vm2, %v5140_v16, %v3303_v21 }
 0xe76   :  { %4306 = vcosq.f32 %v3306_v14  ;;  %v3401_v40 = vand.u32 2147483647, %v3400_v46 }
 0xe77   :  { %4308 = vsinq.f32 %v3306_v14 }
 0xe78   :  { %v3404_v49 = vmul.f32 %v3403_v48, %v3401_v40 }
 0xe7a   :  { %v3405_v26 = vxor.u32 2147483648, %v3404_v49 }
 0xe7c   :  { %v3406_v7 = vsel %vm3323_vm8, %v3405_v26, %v3404_v49 }
 0xe7d   :  { %v3409_v39 = vsel %vm5225_vm9, %v5142_v12, %v3406_v7 }
 0xe7e   :  { %4310 = vcosq.f32 %v3409_v39 }
 0xe7f   :  { %4312 = vsinq.f32 %v3409_v39 }
 0xe80   :  { %v4307_v57 = vpop.eup %4306 }
 0xe81   :  { %v4309_v62 = vpop.eup %4308  ;;  %v3317_v28 = vxor.u32 2147483648, %v4307_v57 }
 0xe82   :  { %v3314_v5 = vxor.u32 2147483648, %v4309_v62 }
 0xe83   :  { %v3318_v27 = vsel %vm3316_vm10, %v3317_v28, %v4309_v62 }
 0xe84   :  { %v3315_v15 = vsel %vm3313_vm11, %v4307_v57, %v3314_v5 }
 0xe85   :  { %v3319_v13 = vsel %vm3312_vm12, %v3315_v15, %v3318_v27 }
 0xe86   :  { %v3320_v55 = vsel %vm3310_vm13, nan, %v3319_v13 }
 0xe87   :  { %4107 = vmatprep.mubr.msk.f32.mxu0 %vm166_vm1, %v3320_v55 }
 0xe88   :  { %v4311_v45 = vpop.eup %4310 }
 0xe89   :  { %v4313_v18 = vpop.eup %4312  ;;  %v3420_v43 = vxor.u32 2147483648, %v4311_v45 }
 0xe8a   :  { %v3417_v9 = vxor.u32 2147483648, %v4313_v18 }
 0xe8b   :  { %v3421_v1 = vsel %vm3419_vm14, %v3420_v43, %v4313_v18 }
 0xe8c   :  { %v3418_v58 = vsel %vm3416_vm15, %v4311_v45, %v3417_v9 }
 0xe8d   :  { %v3422_v24 = vsel %vm3415_vm4, %v3418_v58, %v3421_v1 }
 0xe8e   :  { %v3423_v25 = vsel %vm3413_vm5, nan, %v3422_v24 }
 0xe8f   :  { %4108 = vmatmul.mubr.msk.f32.vlgmr.msra.gmra.mrb[50].mxu0 %vm166_vm1, %v3423_v25 }
 0xf62   :  { %v4109_v16 = vpop.f32.mrb[50].mxu0 }
 0xf63   :  { %v3502_v51 = vadd.f32 %v5075_v63, %v4109_v16  ;;  %v3496_v56 = vpop.f32.mrb[51].mxu0 }
 0xf64   :  { %v3497_v8 = vadd.f32 %v5075_v63, %v3496_v56 }
 0xf65   :  { %v3506_v36 = vmax.f32 %v3502_v51, 0.0 }
 0xf66   :  { %v3505_v20 = vmax.f32 %v3497_v8, 0.0 }
 0xf67   :  { %v3510_v3 = vsel %vm873_vm3, %v3506_v36, -inf  ;;  %v3508_v37 = vsel %vm873_vm3, %v3506_v36, inf }
 0xf68   :  { %v3509_v12 = vsel %vm873_vm3, %v3505_v20, -inf  ;;  %v3525_v34 = vsel %vm166_vm1, %v3510_v3, -inf  ;;  %v3507_v29 = vsel %vm873_vm3, %v3505_v20, inf  ;;  %v3512_v42 = vsel %vm166_vm1, %v3508_v37, inf }
 0xf69   :  { %v3524_v63 = vsel %vm166_vm1, %v3509_v12, -inf  ;;  %v3511_v47 = vsel %vm166_vm1, %v3507_v29, inf }
 0xf6a   :  { %v3526_v4 = vmax.f32 %v3524_v63, %v3525_v34  ;;  %v3513_v31 = vmin.f32 %v3511_v47, %v3512_v42 }
 0xf6c   :  { %3527 = vmax.xlane.f32.xlu1 %v3526_v4  ;;  %3514 = vmin.xlane.f32.xlu0 %v3513_v31 }
 0xff9   :  { %v3528_v44 = vpop.xlane.xlu1 %3527  ;;  %v3515_v33 = vpop.xlane.xlu0 %3514 }
 0xffa   :  { %v3529_v0 = vrot.slane %v3528_v44, 4  ;;  %v3516_v53 = vrot.slane %v3515_v33, 4 }
 0xffc   :  { %v3530_v6 = vmax.f32 %v3528_v44, %v3529_v0  ;;  %v3517_v22 = vmin.f32 %v3515_v33, %v3516_v53 }
 0xffe   :  { %v3531_v23 = vrot.slane %v3530_v6, 2  ;;  %v3518_v11 = vrot.slane %v3517_v22, 2 }
0x1000   :  { %v3532_v30 = vmax.f32 %v3530_v6, %v3531_v23  ;;  %v3519_v2 = vmin.f32 %v3517_v22, %v3518_v11 }
0x1002   :  { %v3520_v10 = vrot.slane %v3519_v2, 1  ;;  %v3533_v17 = vrot.slane %v3532_v30, 1 }
0x1004   :  { %v3521_v32 = vmin.f32 %v3519_v2, %v3520_v10  ;;  %v3534_v19 = vmax.f32 %v3532_v30, %v3533_v17 }
0x1006   :  { %4258 = vpush %v3521_v32 }
0x1007   :  { %4260 = vpush %v3534_v19 }
0x1037   :  { %s4259_s16 = spop %4258 }
0x1038   :  { %v3523_v21 = vstv %s4259_s16  ;;  %s4261_s17 = spop %4260 }
0x1039   :  { %v3536_v35 = vstv %s4261_s17  ;;  %v3537_v40 = vsub.f32 %v3505_v20, %v3523_v21  ;;  %v3538_v48 = vsub.f32 %v3506_v36, %v3523_v21 }
0x103a   :  { %v3539_v14 = vsub.f32 %v3536_v35, %v3523_v21 }
0x103c   :  { %v3540_v46 = vadd.f32 1e-09, %v3539_v14 }
0x103e   :  { %4314 = vrcp.f32 %v3540_v46 }
0x1048   :  { %v4315_v52 = vpop.eup %4314 }
0x1049   :  { %v3542_v49 = vmul.f32 %v4315_v52, %v3537_v40  ;;  %v3543_v61 = vmul.f32 %v4315_v52, %v3538_v48 }
0x104b   :  { %3720 = vst.msk [vmem:[%s5265_s5 + $0x30] sm:$0xff] %vm166_vm1, %v3542_v49  ;;  %3721 = vst.msk [vmem:[%s5265_s5 + $0x38] sm:$0xff] %vm166_vm1, %v3543_v61 }

</bundles_post_ra>
